<compile_context>
chip_gen: v7x
topology: tpu7x:2x2x1
jax: 0.10.0
libtpu: 0.0.40
codegen_flags: <defaults>
</compile_context>

<pallas_src>
import functools
import math

import jax
import jax.numpy as jnp
from jax import lax
from jax.experimental import pallas as pl
from jax.experimental.pallas import tpu as pltpu


# ---------------------------------------------------------------------------
# Fused MHA kernel: one grid step == block_b batch rows, all heads.
# ---------------------------------------------------------------------------
def _mha_kernel(*refs, num_heads, has_mask, compute_dtype, approx_recip):
    if has_mask:
        (x1_ref, x2_ref, mask_ref,
         wq_ref, bq_ref, wk_ref, bk_ref, wv_ref, bv_ref,
         wfc_ref, bfc_ref, o_ref) = refs
    else:
        (x1_ref, x2_ref,
         wq_ref, bq_ref, wk_ref, bk_ref, wv_ref, bv_ref,
         wfc_ref, bfc_ref, o_ref) = refs
        mask_ref = None

    bb, t1, d = x1_ref.shape
    _, t2, _ = x2_ref.shape

    # Flatten the batch block into the matmul M dimension (leading-dim merge,
    # free: T1/T2 are sublane-aligned).
    x1 = x1_ref[...].reshape(bb * t1, d)          # K/V source, compute_dtype
    x2 = x2_ref[...].reshape(bb * t2, d)          # Q source,  compute_dtype

    mask = mask_ref[...] if has_mask else None    # (t2, t1) f32, or None

    out_acc = None
    for h in range(num_heads):                    # static unroll over heads
        # Per-head projections; weights are pre-split by head at the wrapper,
        # so there is NO in-kernel lane slicing of activations.  1/sqrt(hd_k)
        # is already folded into wq/bq.
        q = jnp.dot(x2, wq_ref[h], preferred_element_type=jnp.float32) + bq_ref[h]
        k = jnp.dot(x1, wk_ref[h], preferred_element_type=jnp.float32) + bk_ref[h]
        v = jnp.dot(x1, wv_ref[h], preferred_element_type=jnp.float32) + bv_ref[h]

        q = q.astype(compute_dtype).reshape(bb, t2, -1)   # (bb, T2, hd_k)
        k = k.astype(compute_dtype).reshape(bb, t1, -1)   # (bb, T1, hd_k)
        v = v.astype(compute_dtype).reshape(bb, t1, -1)   # (bb, T1, hd_v)

        # Scores, batched over the block's batch rows; contract the last dims
        # of both operands directly (no transposed-K copy).
        s = lax.dot_general(q, k, (((2,), (2,)), ((0,), (0,))),
                            preferred_element_type=jnp.float32)   # (bb, T2, T1)
        if mask is not None:
            s = s + mask                                          # broadcast

        # Softmax kept in f32 (v5e has no bf16 VPU/EUP); denominator on the EUP.
        s = s - jnp.max(s, axis=-1, keepdims=True)
        p = jnp.exp(s)
        denom = jnp.sum(p, axis=-1, keepdims=True)
        if approx_recip:
            p = p * pl.reciprocal(denom, approx=True)
        else:
            p = p / denom

        ctx = lax.dot_general(p.astype(compute_dtype), v,
                              (((2,), (1,)), ((0,), (0,))),
                              preferred_element_type=jnp.float32)  # (bb, T2, hd_v)

        # Fold this head's slice of the fc projection in directly: no ctx slab,
        # no concat, no cross-lane shuffles.
        contrib = jnp.dot(ctx.reshape(bb * t2, -1).astype(compute_dtype),
                          wfc_ref[h], preferred_element_type=jnp.float32)
        out_acc = contrib if out_acc is None else out_acc + contrib

    out = out_acc + bfc_ref[...]                                   # (bb*T2, D)
    o_ref[...] = out.reshape(bb, t2, -1).astype(o_ref.dtype)


# ---------------------------------------------------------------------------
# Helpers
# ---------------------------------------------------------------------------
def _pick_block_b(batch, t2):
    """Largest divisor of `batch` targeting ~>=128 M rows per step while
    keeping >=2 grid steps (so both v7x TensorCores get work)."""
    target = max(1, 128 // max(t2, 1))
    best = 1
    for bb in range(1, batch + 1):
        if batch % bb:
            continue
        if bb <= target and (batch // bb) >= min(2, batch):
            best = bb
    return best


def _const_spec(shape, single_buffered):
    """Whole-array block, constant index map (grid-invariant operand)."""
    index_map = lambda b, _n=len(shape): (0,) * _n
    if single_buffered:
        # Constant index map -> only one DMA is needed; ask Pallas not to
        # allocate a second buffer for it.
        return pl.BlockSpec(shape, index_map, pipeline_mode=pl.Buffered(1))
    return pl.BlockSpec(shape, index_map)


# ---------------------------------------------------------------------------
# Module-equivalent wrapper
# ---------------------------------------------------------------------------
def multi_head_attention(params, input1, input2, num_heads, mask=None,
                         compute_dtype=jnp.float32, out_dtype=None,
                         block_b=None, approx_reciprocal=True):
    """Equivalent of MultiHeadAttention.forward(input1, input2, mask)."""
    B, T1, D = input1.shape
    B2, T2, D2 = input2.shape
    assert B2 == B and D2 == D

    wq, bq = params["query"]
    wk, bk = params["key"]
    wv, bv = params["value"]
    wfc, bfc = params["fc"]
    k_dim = wq.shape[1]
    v_dim = wv.shape[1]
    d_out = wfc.shape[1]
    assert k_dim % num_heads == 0 and v_dim % num_heads == 0
    hd_k = k_dim // num_heads
    hd_v = v_dim // num_heads
    scale = 1.0 / math.sqrt(hd_k)

    cdt = jnp.dtype(compute_dtype)
    odt = jnp.dtype(out_dtype) if out_dtype is not None else jnp.dtype(jnp.float32)

    if block_b is None:
        block_b = _pick_block_b(B, T2)
    assert B % block_b == 0, "block_b must divide the batch size"
    n_steps = B // block_b

    # --- Operands at the pallas_call boundary ------------------------------
    # bf16 (or f32) activations / weight matrices; biases stay f32 (added to
    # f32 accumulators).  Weights are pre-split per head; 1/sqrt(hd_k) folded
    # into the query projection.
    x1 = input1.astype(cdt)
    x2 = input2.astype(cdt)
    wq_h = (jnp.asarray(wq, jnp.float32) * scale
            ).reshape(D, num_heads, hd_k).transpose(1, 0, 2).astype(cdt)
    wk_h = jnp.asarray(wk).reshape(D, num_heads, hd_k).transpose(1, 0, 2).astype(cdt)
    wv_h = jnp.asarray(wv).reshape(D, num_heads, hd_v).transpose(1, 0, 2).astype(cdt)
    wfc_h = jnp.asarray(wfc).reshape(num_heads, hd_v, d_out).astype(cdt)
    bq_h = (jnp.asarray(bq, jnp.float32) * scale).reshape(num_heads, 1, hd_k)
    bk_h = jnp.asarray(bk, jnp.float32).reshape(num_heads, 1, hd_k)
    bv_h = jnp.asarray(bv, jnp.float32).reshape(num_heads, 1, hd_v)
    bfc2 = jnp.asarray(bfc, jnp.float32).reshape(1, d_out)

    has_mask = mask is not None
    if has_mask:
        mask2d = jnp.asarray(mask, jnp.float32)[:T2]   # mimic mask[:num_tokens2]

    w_args = [wq_h, bq_h, wk_h, bk_h, wv_h, bv_h, wfc_h, bfc2]
    fixed_args = ([mask2d] if has_mask else []) + w_args

    # Explicit VMEM budget (defaults: ~16 MiB scoped v5e, 32 MiB v6e/v7x):
    # double-buffered x/out blocks + constants + f32 temporaries, with slack.
    blk_bytes = (block_b * (T1 + T2) * D * cdt.itemsize
                 + block_b * T2 * d_out * odt.itemsize)
    const_bytes = sum(int(a.size) * a.dtype.itemsize for a in fixed_args)
    hd = max(hd_k, hd_v)
    temp_bytes = 4 * block_b * (T2 * T1 + (T1 + T2) * (hd + D) + 2 * T2 * d_out)
    vmem_limit = int(min(max(2 * blk_bytes + 2 * const_bytes + 3 * temp_bytes
                             + (2 << 20), 16 << 20), 64 << 20))

    kernel = functools.partial(
        _mha_kernel, num_heads=num_heads, has_mask=has_mask,
        compute_dtype=cdt, approx_recip=approx_reciprocal)

    def _call(single_buffer_weights):
        args = [x1, x2]
        in_specs = [
            pl.BlockSpec((block_b, T1, D), lambda b: (b, 0, 0)),
            pl.BlockSpec((block_b, T2, D), lambda b: (b, 0, 0)),
        ]
        if has_mask:
            args.append(mask2d)
            in_specs.append(_const_spec((T2, T1), single_buffer_weights))
        args += w_args
        in_specs += [_const_spec(a.shape, single_buffer_weights) for a in w_args]

        return pl.pallas_call(
            kernel,
            out_shape=jax.ShapeDtypeStruct((B, T2, d_out), odt),
            grid=(n_steps,),
            in_specs=in_specs,
            out_specs=pl.BlockSpec((block_b, T2, d_out), lambda b: (b, 0, 0)),
            compiler_params=pltpu.CompilerParams(
                dimension_semantics=("parallel",),   # batch blocks across TCs (v7x)
                vmem_limit_bytes=vmem_limit),
        )(*args)

    try:
        return _call(True)
    except Exception:
        # pl.Buffered(1) / pipeline_mode not supported on this jax version:
        # fall back to default (double-buffered) grid-constant blocks.
        return _call(False)


# ---------------------------------------------------------------------------
# Parameter init mimicking nn.Linear's U(-1/sqrt(fan_in), 1/sqrt(fan_in))
# ---------------------------------------------------------------------------
def init_params(key, main_dim, k_dim, v_dim):
    ks = jax.random.split(key, 8)

    def lin(kw, kb, din, dout):
        bound = 1.0 / math.sqrt(din)
        w = jax.random.uniform(kw, (din, dout), jnp.float32, -bound, bound)
        b = jax.random.uniform(kb, (dout,), jnp.float32, -bound, bound)
        return w, b

    return {
        "query": lin(ks[0], ks[1], main_dim, k_dim),
        "key": lin(ks[2], ks[3], main_dim, k_dim),
        "value": lin(ks[4], ks[5], main_dim, v_dim),
        "fc": lin(ks[6], ks[7], v_dim, main_dim),
    }


# ---------------------------------------------------------------------------
# Pure-JAX reference (high-precision matmuls for a stable comparison target)
# ---------------------------------------------------------------------------
def reference(params, input1, input2, num_heads, mask=None):
    B1, T1, D = input1.shape
    B2, T2, _ = input2.shape
    wq, bq = params["query"]
    wk, bk = params["key"]
    wv, bv = params["value"]
    wfc, bfc = params["fc"]
    k_dim = wq.shape[1]
    v_dim = wv.shape[1]
    hd_k = k_dim // num_heads
    hd_v = v_dim // num_heads
    hp = jax.lax.Precision.HIGHEST
    q = jnp.dot(input2, wq, precision=hp) + bq
    k = jnp.dot(input1, wk, precision=hp) + bk
    v = jnp.dot(input1, wv, precision=hp) + bv
    q = q.reshape(B2, T2, num_heads, hd_k).transpose(0, 2, 1, 3)
    k = k.reshape(B1, T1, num_heads, hd_k).transpose(0, 2, 1, 3)
    v = v.reshape(B1, T1, num_heads, hd_v).transpose(0, 2, 1, 3)
    s = jnp.einsum("bhqd,bhkd->bhqk", q, k, precision=hp) / math.sqrt(hd_k)
    if mask is not None:
        s = s + mask[:T2]
    p = jax.nn.softmax(s, axis=-1)
    ctx = jnp.einsum("bhqk,bhkd->bhqd", p, v, precision=hp)
    ctx = ctx.transpose(0, 2, 1, 3).reshape(B2, T2, num_heads * hd_v)
    return jnp.dot(ctx, wfc, precision=hp) + bfc


if __name__ == "__main__":
    root = jax.random.PRNGKey(0)
    kp, k1, k2, km = jax.random.split(root, 4)

    T1, T2 = 8, 8
    main_dim, num_heads = 32, 4
    mask = jax.random.normal(km, (T2, T1), jnp.float32)

    def check(B, k_dim, v_dim, use_mask, compute_dtype, tol):
        params = init_params(kp, main_dim, k_dim, v_dim)
        input1 = jax.random.normal(k1, (B, T1, main_dim), jnp.float32)  # K/V src
        input2 = jax.random.normal(k2, (B, T2, main_dim), jnp.float32)  # Q src
        m = mask if use_mask else None
        out = multi_head_attention(params, input1, input2, num_heads,
                                   mask=m, compute_dtype=compute_dtype)
        out = jax.block_until_ready(out)
        ref = reference(params, input1, input2, num_heads, mask=m)
        assert out.shape == (B, T2, main_dim)
        err = float(jnp.max(jnp.abs(out - ref)))
        assert jnp.allclose(out, ref, atol=tol, rtol=tol), (
            f"mismatch B={B} k_dim={k_dim} v_dim={v_dim} mask={use_mask} "
            f"dtype={compute_dtype} max|diff|={err}")

    # Tolerances cover approx-reciprocal + MXU-vs-XLA matmul precision deltas.
    # f32 compute; B=2 -> block_b=1, grid=(2,) (>=2 steps for v7x megacore).
    check(2, main_dim, main_dim, False, jnp.float32, 1e-2)
    # With additive attention mask.
    check(2, main_dim, main_dim, True, jnp.float32, 1e-2)
    # k_dim != v_dim (different K and V head dims).
    check(2, 32, 64, False, jnp.float32, 1e-2)
    # Batch-blocked path: B=4 -> block_b=2, two batch rows per grid step.
    check(4, main_dim, main_dim, True, jnp.float32, 1e-2)
    # bf16 operands at the pallas_call boundary (v5e/v6e/v7x MXU fast path),
    # f32 accumulation and f32 softmax inside the kernel.
    check(2, main_dim, main_dim, False, jnp.bfloat16, 1.5e-1)

    print("KERNEL_OK")
</pallas_src>

<mosaic_0001>
module attributes {stable_mosaic.version = 11 : i64} {
  func.func @_mha_kernel(%arg0: i32, %arg1: memref<1x8x32xf32, #tpu.memory_space<vmem>>, %arg2: memref<1x8x32xf32, #tpu.memory_space<vmem>>, %arg3: memref<4x32x8xf32, #tpu.memory_space<vmem>>, %arg4: memref<4x1x8xf32, #tpu.memory_space<vmem>>, %arg5: memref<4x32x8xf32, #tpu.memory_space<vmem>>, %arg6: memref<4x1x8xf32, #tpu.memory_space<vmem>>, %arg7: memref<4x32x8xf32, #tpu.memory_space<vmem>>, %arg8: memref<4x1x8xf32, #tpu.memory_space<vmem>>, %arg9: memref<4x8x32xf32, #tpu.memory_space<vmem>>, %arg10: memref<1x32xf32, #tpu.memory_space<vmem>>, %arg11: memref<1x8x32xf32, #tpu.memory_space<vmem>>) attributes {dimension_semantics = [#tpu.dimension_semantics<parallel>], iteration_bounds = array<i64: 2>, scalar_prefetch = 0 : i64, scratch_operands = 0 : i64, tpu.core_type = #tpu.core_type<tc>, window_params = [{transform_indices = @transform_0, window_bounds = array<i64: 1, 8, 32>}, {transform_indices = @transform_1, window_bounds = array<i64: 1, 8, 32>}, {pipeline_mode = #tpu.pipeline_mode<synchronous>, transform_indices = @transform_2, window_bounds = array<i64: 4, 32, 8>}, {pipeline_mode = #tpu.pipeline_mode<synchronous>, transform_indices = @transform_3, window_bounds = array<i64: 4, 1, 8>}, {pipeline_mode = #tpu.pipeline_mode<synchronous>, transform_indices = @transform_4, window_bounds = array<i64: 4, 32, 8>}, {pipeline_mode = #tpu.pipeline_mode<synchronous>, transform_indices = @transform_5, window_bounds = array<i64: 4, 1, 8>}, {pipeline_mode = #tpu.pipeline_mode<synchronous>, transform_indices = @transform_6, window_bounds = array<i64: 4, 32, 8>}, {pipeline_mode = #tpu.pipeline_mode<synchronous>, transform_indices = @transform_7, window_bounds = array<i64: 4, 1, 8>}, {pipeline_mode = #tpu.pipeline_mode<synchronous>, transform_indices = @transform_8, window_bounds = array<i64: 4, 8, 32>}, {pipeline_mode = #tpu.pipeline_mode<synchronous>, transform_indices = @transform_9, window_bounds = array<i64: 1, 32>}, {transform_indices = @transform_10, window_bounds = array<i64: 1, 8, 32>}]} {
    %c0 = arith.constant 0 : index
    %c0_0 = arith.constant 0 : index
    %c0_1 = arith.constant 0 : index
    %0 = vector.load %arg1[%c0, %c0_0, %c0_1] : memref<1x8x32xf32, #tpu.memory_space<vmem>>, vector<1x8x32xf32>
    %1 = vector.shape_cast %0 : vector<1x8x32xf32> to vector<8x32xf32>
    %c0_2 = arith.constant 0 : index
    %c0_3 = arith.constant 0 : index
    %c0_4 = arith.constant 0 : index
    %2 = vector.load %arg2[%c0_2, %c0_3, %c0_4] : memref<1x8x32xf32, #tpu.memory_space<vmem>>, vector<1x8x32xf32>
    %3 = vector.shape_cast %2 : vector<1x8x32xf32> to vector<8x32xf32>
    %c0_5 = arith.constant 0 : index
    %c0_6 = arith.constant 0 : index
    %c0_7 = arith.constant 0 : index
    %4 = vector.load %arg3[%c0_5, %c0_6, %c0_7] : memref<4x32x8xf32, #tpu.memory_space<vmem>>, vector<1x32x8xf32>
    %5 = vector.shape_cast %4 : vector<1x32x8xf32> to vector<32x8xf32>
    %cst = arith.constant dense<0.000000e+00> : vector<8x8xf32>
    %6 = tpu.matmul %3, %5, %cst {dimension_numbers = #tpu.dot_dimension_numbers<[1], [0], [0], [1], [0, 0, 1, 1], [], []>} : vector<8x32xf32>, vector<32x8xf32>, vector<8x8xf32> -> vector<8x8xf32>
    %c0_8 = arith.constant 0 : index
    %c0_9 = arith.constant 0 : index
    %c0_10 = arith.constant 0 : index
    %7 = vector.load %arg4[%c0_8, %c0_9, %c0_10] : memref<4x1x8xf32, #tpu.memory_space<vmem>>, vector<1x1x8xf32>
    %8 = vector.shape_cast %7 : vector<1x1x8xf32> to vector<1x8xf32>
    %9 = vector.broadcast %8 : vector<1x8xf32> to vector<8x8xf32>
    %10 = arith.addf %6, %9 : vector<8x8xf32>
    %c0_11 = arith.constant 0 : index
    %c0_12 = arith.constant 0 : index
    %c0_13 = arith.constant 0 : index
    %11 = vector.load %arg5[%c0_11, %c0_12, %c0_13] : memref<4x32x8xf32, #tpu.memory_space<vmem>>, vector<1x32x8xf32>
    %12 = vector.shape_cast %11 : vector<1x32x8xf32> to vector<32x8xf32>
    %cst_14 = arith.constant dense<0.000000e+00> : vector<8x8xf32>
    %13 = tpu.matmul %1, %12, %cst_14 {dimension_numbers = #tpu.dot_dimension_numbers<[1], [0], [0], [1], [0, 0, 1, 1], [], []>} : vector<8x32xf32>, vector<32x8xf32>, vector<8x8xf32> -> vector<8x8xf32>
    %c0_15 = arith.constant 0 : index
    %c0_16 = arith.constant 0 : index
    %c0_17 = arith.constant 0 : index
    %14 = vector.load %arg6[%c0_15, %c0_16, %c0_17] : memref<4x1x8xf32, #tpu.memory_space<vmem>>, vector<1x1x8xf32>
    %15 = vector.shape_cast %14 : vector<1x1x8xf32> to vector<1x8xf32>
    %16 = vector.broadcast %15 : vector<1x8xf32> to vector<8x8xf32>
    %17 = arith.addf %13, %16 : vector<8x8xf32>
    %c0_18 = arith.constant 0 : index
    %c0_19 = arith.constant 0 : index
    %c0_20 = arith.constant 0 : index
    %18 = vector.load %arg7[%c0_18, %c0_19, %c0_20] : memref<4x32x8xf32, #tpu.memory_space<vmem>>, vector<1x32x8xf32>
    %19 = vector.shape_cast %18 : vector<1x32x8xf32> to vector<32x8xf32>
    %cst_21 = arith.constant dense<0.000000e+00> : vector<8x8xf32>
    %20 = tpu.matmul %1, %19, %cst_21 {dimension_numbers = #tpu.dot_dimension_numbers<[1], [0], [0], [1], [0, 0, 1, 1], [], []>} : vector<8x32xf32>, vector<32x8xf32>, vector<8x8xf32> -> vector<8x8xf32>
    %c0_22 = arith.constant 0 : index
    %c0_23 = arith.constant 0 : index
    %c0_24 = arith.constant 0 : index
    %21 = vector.load %arg8[%c0_22, %c0_23, %c0_24] : memref<4x1x8xf32, #tpu.memory_space<vmem>>, vector<1x1x8xf32>
    %22 = vector.shape_cast %21 : vector<1x1x8xf32> to vector<1x8xf32>
    %23 = vector.broadcast %22 : vector<1x8xf32> to vector<8x8xf32>
    %24 = arith.addf %20, %23 : vector<8x8xf32>
    %25 = vector.shape_cast %10 : vector<8x8xf32> to vector<1x8x8xf32>
    %26 = vector.shape_cast %17 : vector<8x8xf32> to vector<1x8x8xf32>
    %27 = vector.shape_cast %24 : vector<8x8xf32> to vector<1x8x8xf32>
    %cst_25 = arith.constant dense<0.000000e+00> : vector<1x8x8xf32>
    %28 = tpu.matmul %25, %26, %cst_25 {dimension_numbers = #tpu.dot_dimension_numbers<[2], [2], [1], [1], [0, 0, 0, 1, 1, 1], [0], [0]>} : vector<1x8x8xf32>, vector<1x8x8xf32>, vector<1x8x8xf32> -> vector<1x8x8xf32>
    %cst_26 = arith.constant dense<0xFF800000> : vector<1x8xf32>
    %29 = vector.multi_reduction <maximumf>, %28, %cst_26 [2] : vector<1x8x8xf32> to vector<1x8xf32>
    %30 = vector.shape_cast %29 : vector<1x8xf32> to vector<1x8x1xf32>
    %31 = vector.broadcast %30 : vector<1x8x1xf32> to vector<1x8x8xf32>
    %32 = arith.subf %28, %31 : vector<1x8x8xf32>
    %33 = math.exp %32 : vector<1x8x8xf32>
    %cst_27 = arith.constant dense<0.000000e+00> : vector<1x8xf32>
    %34 = vector.multi_reduction <add>, %33, %cst_27 [2] : vector<1x8x8xf32> to vector<1x8xf32>
    %35 = vector.shape_cast %34 : vector<1x8xf32> to vector<1x8x1xf32>
    %36 = tpu.reciprocal %35 {approx = true} : vector<1x8x1xf32> -> vector<1x8x1xf32>
    %37 = vector.broadcast %36 : vector<1x8x1xf32> to vector<1x8x8xf32>
    %38 = arith.mulf %33, %37 : vector<1x8x8xf32>
    %cst_28 = arith.constant dense<0.000000e+00> : vector<1x8x8xf32>
    %39 = tpu.matmul %38, %27, %cst_28 {dimension_numbers = #tpu.dot_dimension_numbers<[2], [1], [1], [2], [0, 0, 0, 1, 1, 2], [0], [0]>} : vector<1x8x8xf32>, vector<1x8x8xf32>, vector<1x8x8xf32> -> vector<1x8x8xf32>
    %40 = vector.shape_cast %39 : vector<1x8x8xf32> to vector<8x8xf32>
    %c0_29 = arith.constant 0 : index
    %c0_30 = arith.constant 0 : index
    %c0_31 = arith.constant 0 : index
    %41 = vector.load %arg9[%c0_29, %c0_30, %c0_31] : memref<4x8x32xf32, #tpu.memory_space<vmem>>, vector<1x8x32xf32>
    %42 = vector.shape_cast %41 : vector<1x8x32xf32> to vector<8x32xf32>
    %cst_32 = arith.constant dense<0.000000e+00> : vector<8x32xf32>
    %43 = tpu.matmul %40, %42, %cst_32 {dimension_numbers = #tpu.dot_dimension_numbers<[1], [0], [0], [1], [0, 0, 1, 1], [], []>} : vector<8x8xf32>, vector<8x32xf32>, vector<8x32xf32> -> vector<8x32xf32>
    %c1 = arith.constant 1 : index
    %c0_33 = arith.constant 0 : index
    %c0_34 = arith.constant 0 : index
    %44 = vector.load %arg3[%c1, %c0_33, %c0_34] : memref<4x32x8xf32, #tpu.memory_space<vmem>>, vector<1x32x8xf32>
    %45 = vector.shape_cast %44 : vector<1x32x8xf32> to vector<32x8xf32>
    %cst_35 = arith.constant dense<0.000000e+00> : vector<8x8xf32>
    %46 = tpu.matmul %3, %45, %cst_35 {dimension_numbers = #tpu.dot_dimension_numbers<[1], [0], [0], [1], [0, 0, 1, 1], [], []>} : vector<8x32xf32>, vector<32x8xf32>, vector<8x8xf32> -> vector<8x8xf32>
    %c1_36 = arith.constant 1 : index
    %c0_37 = arith.constant 0 : index
    %c0_38 = arith.constant 0 : index
    %47 = vector.load %arg4[%c1_36, %c0_37, %c0_38] : memref<4x1x8xf32, #tpu.memory_space<vmem>>, vector<1x1x8xf32>
    %48 = vector.shape_cast %47 : vector<1x1x8xf32> to vector<1x8xf32>
    %49 = vector.broadcast %48 : vector<1x8xf32> to vector<8x8xf32>
    %50 = arith.addf %46, %49 : vector<8x8xf32>
    %c1_39 = arith.constant 1 : index
    %c0_40 = arith.constant 0 : index
    %c0_41 = arith.constant 0 : index
    %51 = vector.load %arg5[%c1_39, %c0_40, %c0_41] : memref<4x32x8xf32, #tpu.memory_space<vmem>>, vector<1x32x8xf32>
    %52 = vector.shape_cast %51 : vector<1x32x8xf32> to vector<32x8xf32>
    %cst_42 = arith.constant dense<0.000000e+00> : vector<8x8xf32>
    %53 = tpu.matmul %1, %52, %cst_42 {dimension_numbers = #tpu.dot_dimension_numbers<[1], [0], [0], [1], [0, 0, 1, 1], [], []>} : vector<8x32xf32>, vector<32x8xf32>, vector<8x8xf32> -> vector<8x8xf32>
    %c1_43 = arith.constant 1 : index
    %c0_44 = arith.constant 0 : index
    %c0_45 = arith.constant 0 : index
    %54 = vector.load %arg6[%c1_43, %c0_44, %c0_45] : memref<4x1x8xf32, #tpu.memory_space<vmem>>, vector<1x1x8xf32>
    %55 = vector.shape_cast %54 : vector<1x1x8xf32> to vector<1x8xf32>
    %56 = vector.broadcast %55 : vector<1x8xf32> to vector<8x8xf32>
    %57 = arith.addf %53, %56 : vector<8x8xf32>
    %c1_46 = arith.constant 1 : index
    %c0_47 = arith.constant 0 : index
    %c0_48 = arith.constant 0 : index
    %58 = vector.load %arg7[%c1_46, %c0_47, %c0_48] : memref<4x32x8xf32, #tpu.memory_space<vmem>>, vector<1x32x8xf32>
    %59 = vector.shape_cast %58 : vector<1x32x8xf32> to vector<32x8xf32>
    %cst_49 = arith.constant dense<0.000000e+00> : vector<8x8xf32>
    %60 = tpu.matmul %1, %59, %cst_49 {dimension_numbers = #tpu.dot_dimension_numbers<[1], [0], [0], [1], [0, 0, 1, 1], [], []>} : vector<8x32xf32>, vector<32x8xf32>, vector<8x8xf32> -> vector<8x8xf32>
    %c1_50 = arith.constant 1 : index
    %c0_51 = arith.constant 0 : index
    %c0_52 = arith.constant 0 : index
    %61 = vector.load %arg8[%c1_50, %c0_51, %c0_52] : memref<4x1x8xf32, #tpu.memory_space<vmem>>, vector<1x1x8xf32>
    %62 = vector.shape_cast %61 : vector<1x1x8xf32> to vector<1x8xf32>
    %63 = vector.broadcast %62 : vector<1x8xf32> to vector<8x8xf32>
    %64 = arith.addf %60, %63 : vector<8x8xf32>
    %65 = vector.shape_cast %50 : vector<8x8xf32> to vector<1x8x8xf32>
    %66 = vector.shape_cast %57 : vector<8x8xf32> to vector<1x8x8xf32>
    %67 = vector.shape_cast %64 : vector<8x8xf32> to vector<1x8x8xf32>
    %cst_53 = arith.constant dense<0.000000e+00> : vector<1x8x8xf32>
    %68 = tpu.matmul %65, %66, %cst_53 {dimension_numbers = #tpu.dot_dimension_numbers<[2], [2], [1], [1], [0, 0, 0, 1, 1, 1], [0], [0]>} : vector<1x8x8xf32>, vector<1x8x8xf32>, vector<1x8x8xf32> -> vector<1x8x8xf32>
    %cst_54 = arith.constant dense<0xFF800000> : vector<1x8xf32>
    %69 = vector.multi_reduction <maximumf>, %68, %cst_54 [2] : vector<1x8x8xf32> to vector<1x8xf32>
    %70 = vector.shape_cast %69 : vector<1x8xf32> to vector<1x8x1xf32>
    %71 = vector.broadcast %70 : vector<1x8x1xf32> to vector<1x8x8xf32>
    %72 = arith.subf %68, %71 : vector<1x8x8xf32>
    %73 = math.exp %72 : vector<1x8x8xf32>
    %cst_55 = arith.constant dense<0.000000e+00> : vector<1x8xf32>
    %74 = vector.multi_reduction <add>, %73, %cst_55 [2] : vector<1x8x8xf32> to vector<1x8xf32>
    %75 = vector.shape_cast %74 : vector<1x8xf32> to vector<1x8x1xf32>
    %76 = tpu.reciprocal %75 {approx = true} : vector<1x8x1xf32> -> vector<1x8x1xf32>
    %77 = vector.broadcast %76 : vector<1x8x1xf32> to vector<1x8x8xf32>
    %78 = arith.mulf %73, %77 : vector<1x8x8xf32>
    %cst_56 = arith.constant dense<0.000000e+00> : vector<1x8x8xf32>
    %79 = tpu.matmul %78, %67, %cst_56 {dimension_numbers = #tpu.dot_dimension_numbers<[2], [1], [1], [2], [0, 0, 0, 1, 1, 2], [0], [0]>} : vector<1x8x8xf32>, vector<1x8x8xf32>, vector<1x8x8xf32> -> vector<1x8x8xf32>
    %80 = vector.shape_cast %79 : vector<1x8x8xf32> to vector<8x8xf32>
    %c1_57 = arith.constant 1 : index
    %c0_58 = arith.constant 0 : index
    %c0_59 = arith.constant 0 : index
    %81 = vector.load %arg9[%c1_57, %c0_58, %c0_59] : memref<4x8x32xf32, #tpu.memory_space<vmem>>, vector<1x8x32xf32>
    %82 = vector.shape_cast %81 : vector<1x8x32xf32> to vector<8x32xf32>
    %cst_60 = arith.constant dense<0.000000e+00> : vector<8x32xf32>
    %83 = tpu.matmul %80, %82, %cst_60 {dimension_numbers = #tpu.dot_dimension_numbers<[1], [0], [0], [1], [0, 0, 1, 1], [], []>} : vector<8x8xf32>, vector<8x32xf32>, vector<8x32xf32> -> vector<8x32xf32>
    %84 = arith.addf %43, %83 : vector<8x32xf32>
    %c2 = arith.constant 2 : index
    %c0_61 = arith.constant 0 : index
    %c0_62 = arith.constant 0 : index
    %85 = vector.load %arg3[%c2, %c0_61, %c0_62] : memref<4x32x8xf32, #tpu.memory_space<vmem>>, vector<1x32x8xf32>
    %86 = vector.shape_cast %85 : vector<1x32x8xf32> to vector<32x8xf32>
    %cst_63 = arith.constant dense<0.000000e+00> : vector<8x8xf32>
    %87 = tpu.matmul %3, %86, %cst_63 {dimension_numbers = #tpu.dot_dimension_numbers<[1], [0], [0], [1], [0, 0, 1, 1], [], []>} : vector<8x32xf32>, vector<32x8xf32>, vector<8x8xf32> -> vector<8x8xf32>
    %c2_64 = arith.constant 2 : index
    %c0_65 = arith.constant 0 : index
    %c0_66 = arith.constant 0 : index
    %88 = vector.load %arg4[%c2_64, %c0_65, %c0_66] : memref<4x1x8xf32, #tpu.memory_space<vmem>>, vector<1x1x8xf32>
    %89 = vector.shape_cast %88 : vector<1x1x8xf32> to vector<1x8xf32>
    %90 = vector.broadcast %89 : vector<1x8xf32> to vector<8x8xf32>
    %91 = arith.addf %87, %90 : vector<8x8xf32>
    %c2_67 = arith.constant 2 : index
    %c0_68 = arith.constant 0 : index
    %c0_69 = arith.constant 0 : index
    %92 = vector.load %arg5[%c2_67, %c0_68, %c0_69] : memref<4x32x8xf32, #tpu.memory_space<vmem>>, vector<1x32x8xf32>
    %93 = vector.shape_cast %92 : vector<1x32x8xf32> to vector<32x8xf32>
    %cst_70 = arith.constant dense<0.000000e+00> : vector<8x8xf32>
    %94 = tpu.matmul %1, %93, %cst_70 {dimension_numbers = #tpu.dot_dimension_numbers<[1], [0], [0], [1], [0, 0, 1, 1], [], []>} : vector<8x32xf32>, vector<32x8xf32>, vector<8x8xf32> -> vector<8x8xf32>
    %c2_71 = arith.constant 2 : index
    %c0_72 = arith.constant 0 : index
    %c0_73 = arith.constant 0 : index
    %95 = vector.load %arg6[%c2_71, %c0_72, %c0_73] : memref<4x1x8xf32, #tpu.memory_space<vmem>>, vector<1x1x8xf32>
    %96 = vector.shape_cast %95 : vector<1x1x8xf32> to vector<1x8xf32>
    %97 = vector.broadcast %96 : vector<1x8xf32> to vector<8x8xf32>
    %98 = arith.addf %94, %97 : vector<8x8xf32>
    %c2_74 = arith.constant 2 : index
    %c0_75 = arith.constant 0 : index
    %c0_76 = arith.constant 0 : index
    %99 = vector.load %arg7[%c2_74, %c0_75, %c0_76] : memref<4x32x8xf32, #tpu.memory_space<vmem>>, vector<1x32x8xf32>
    %100 = vector.shape_cast %99 : vector<1x32x8xf32> to vector<32x8xf32>
    %cst_77 = arith.constant dense<0.000000e+00> : vector<8x8xf32>
    %101 = tpu.matmul %1, %100, %cst_77 {dimension_numbers = #tpu.dot_dimension_numbers<[1], [0], [0], [1], [0, 0, 1, 1], [], []>} : vector<8x32xf32>, vector<32x8xf32>, vector<8x8xf32> -> vector<8x8xf32>
    %c2_78 = arith.constant 2 : index
    %c0_79 = arith.constant 0 : index
    %c0_80 = arith.constant 0 : index
    %102 = vector.load %arg8[%c2_78, %c0_79, %c0_80] : memref<4x1x8xf32, #tpu.memory_space<vmem>>, vector<1x1x8xf32>
    %103 = vector.shape_cast %102 : vector<1x1x8xf32> to vector<1x8xf32>
    %104 = vector.broadcast %103 : vector<1x8xf32> to vector<8x8xf32>
    %105 = arith.addf %101, %104 : vector<8x8xf32>
    %106 = vector.shape_cast %91 : vector<8x8xf32> to vector<1x8x8xf32>
    %107 = vector.shape_cast %98 : vector<8x8xf32> to vector<1x8x8xf32>
    %108 = vector.shape_cast %105 : vector<8x8xf32> to vector<1x8x8xf32>
    %cst_81 = arith.constant dense<0.000000e+00> : vector<1x8x8xf32>
    %109 = tpu.matmul %106, %107, %cst_81 {dimension_numbers = #tpu.dot_dimension_numbers<[2], [2], [1], [1], [0, 0, 0, 1, 1, 1], [0], [0]>} : vector<1x8x8xf32>, vector<1x8x8xf32>, vector<1x8x8xf32> -> vector<1x8x8xf32>
    %cst_82 = arith.constant dense<0xFF800000> : vector<1x8xf32>
    %110 = vector.multi_reduction <maximumf>, %109, %cst_82 [2] : vector<1x8x8xf32> to vector<1x8xf32>
    %111 = vector.shape_cast %110 : vector<1x8xf32> to vector<1x8x1xf32>
    %112 = vector.broadcast %111 : vector<1x8x1xf32> to vector<1x8x8xf32>
    %113 = arith.subf %109, %112 : vector<1x8x8xf32>
    %114 = math.exp %113 : vector<1x8x8xf32>
    %cst_83 = arith.constant dense<0.000000e+00> : vector<1x8xf32>
    %115 = vector.multi_reduction <add>, %114, %cst_83 [2] : vector<1x8x8xf32> to vector<1x8xf32>
    %116 = vector.shape_cast %115 : vector<1x8xf32> to vector<1x8x1xf32>
    %117 = tpu.reciprocal %116 {approx = true} : vector<1x8x1xf32> -> vector<1x8x1xf32>
    %118 = vector.broadcast %117 : vector<1x8x1xf32> to vector<1x8x8xf32>
    %119 = arith.mulf %114, %118 : vector<1x8x8xf32>
    %cst_84 = arith.constant dense<0.000000e+00> : vector<1x8x8xf32>
    %120 = tpu.matmul %119, %108, %cst_84 {dimension_numbers = #tpu.dot_dimension_numbers<[2], [1], [1], [2], [0, 0, 0, 1, 1, 2], [0], [0]>} : vector<1x8x8xf32>, vector<1x8x8xf32>, vector<1x8x8xf32> -> vector<1x8x8xf32>
    %121 = vector.shape_cast %120 : vector<1x8x8xf32> to vector<8x8xf32>
    %c2_85 = arith.constant 2 : index
    %c0_86 = arith.constant 0 : index
    %c0_87 = arith.constant 0 : index
    %122 = vector.load %arg9[%c2_85, %c0_86, %c0_87] : memref<4x8x32xf32, #tpu.memory_space<vmem>>, vector<1x8x32xf32>
    %123 = vector.shape_cast %122 : vector<1x8x32xf32> to vector<8x32xf32>
    %cst_88 = arith.constant dense<0.000000e+00> : vector<8x32xf32>
    %124 = tpu.matmul %121, %123, %cst_88 {dimension_numbers = #tpu.dot_dimension_numbers<[1], [0], [0], [1], [0, 0, 1, 1], [], []>} : vector<8x8xf32>, vector<8x32xf32>, vector<8x32xf32> -> vector<8x32xf32>
    %125 = arith.addf %84, %124 : vector<8x32xf32>
    %c3 = arith.constant 3 : index
    %c0_89 = arith.constant 0 : index
    %c0_90 = arith.constant 0 : index
    %126 = vector.load %arg3[%c3, %c0_89, %c0_90] : memref<4x32x8xf32, #tpu.memory_space<vmem>>, vector<1x32x8xf32>
    %127 = vector.shape_cast %126 : vector<1x32x8xf32> to vector<32x8xf32>
    %cst_91 = arith.constant dense<0.000000e+00> : vector<8x8xf32>
    %128 = tpu.matmul %3, %127, %cst_91 {dimension_numbers = #tpu.dot_dimension_numbers<[1], [0], [0], [1], [0, 0, 1, 1], [], []>} : vector<8x32xf32>, vector<32x8xf32>, vector<8x8xf32> -> vector<8x8xf32>
    %c3_92 = arith.constant 3 : index
    %c0_93 = arith.constant 0 : index
    %c0_94 = arith.constant 0 : index
    %129 = vector.load %arg4[%c3_92, %c0_93, %c0_94] : memref<4x1x8xf32, #tpu.memory_space<vmem>>, vector<1x1x8xf32>
    %130 = vector.shape_cast %129 : vector<1x1x8xf32> to vector<1x8xf32>
    %131 = vector.broadcast %130 : vector<1x8xf32> to vector<8x8xf32>
    %132 = arith.addf %128, %131 : vector<8x8xf32>
    %c3_95 = arith.constant 3 : index
    %c0_96 = arith.constant 0 : index
    %c0_97 = arith.constant 0 : index
    %133 = vector.load %arg5[%c3_95, %c0_96, %c0_97] : memref<4x32x8xf32, #tpu.memory_space<vmem>>, vector<1x32x8xf32>
    %134 = vector.shape_cast %133 : vector<1x32x8xf32> to vector<32x8xf32>
    %cst_98 = arith.constant dense<0.000000e+00> : vector<8x8xf32>
    %135 = tpu.matmul %1, %134, %cst_98 {dimension_numbers = #tpu.dot_dimension_numbers<[1], [0], [0], [1], [0, 0, 1, 1], [], []>} : vector<8x32xf32>, vector<32x8xf32>, vector<8x8xf32> -> vector<8x8xf32>
    %c3_99 = arith.constant 3 : index
    %c0_100 = arith.constant 0 : index
    %c0_101 = arith.constant 0 : index
    %136 = vector.load %arg6[%c3_99, %c0_100, %c0_101] : memref<4x1x8xf32, #tpu.memory_space<vmem>>, vector<1x1x8xf32>
    %137 = vector.shape_cast %136 : vector<1x1x8xf32> to vector<1x8xf32>
    %138 = vector.broadcast %137 : vector<1x8xf32> to vector<8x8xf32>
    %139 = arith.addf %135, %138 : vector<8x8xf32>
    %c3_102 = arith.constant 3 : index
    %c0_103 = arith.constant 0 : index
    %c0_104 = arith.constant 0 : index
    %140 = vector.load %arg7[%c3_102, %c0_103, %c0_104] : memref<4x32x8xf32, #tpu.memory_space<vmem>>, vector<1x32x8xf32>
    %141 = vector.shape_cast %140 : vector<1x32x8xf32> to vector<32x8xf32>
    %cst_105 = arith.constant dense<0.000000e+00> : vector<8x8xf32>
    %142 = tpu.matmul %1, %141, %cst_105 {dimension_numbers = #tpu.dot_dimension_numbers<[1], [0], [0], [1], [0, 0, 1, 1], [], []>} : vector<8x32xf32>, vector<32x8xf32>, vector<8x8xf32> -> vector<8x8xf32>
    %c3_106 = arith.constant 3 : index
    %c0_107 = arith.constant 0 : index
    %c0_108 = arith.constant 0 : index
    %143 = vector.load %arg8[%c3_106, %c0_107, %c0_108] : memref<4x1x8xf32, #tpu.memory_space<vmem>>, vector<1x1x8xf32>
    %144 = vector.shape_cast %143 : vector<1x1x8xf32> to vector<1x8xf32>
    %145 = vector.broadcast %144 : vector<1x8xf32> to vector<8x8xf32>
    %146 = arith.addf %142, %145 : vector<8x8xf32>
    %147 = vector.shape_cast %132 : vector<8x8xf32> to vector<1x8x8xf32>
    %148 = vector.shape_cast %139 : vector<8x8xf32> to vector<1x8x8xf32>
    %149 = vector.shape_cast %146 : vector<8x8xf32> to vector<1x8x8xf32>
    %cst_109 = arith.constant dense<0.000000e+00> : vector<1x8x8xf32>
    %150 = tpu.matmul %147, %148, %cst_109 {dimension_numbers = #tpu.dot_dimension_numbers<[2], [2], [1], [1], [0, 0, 0, 1, 1, 1], [0], [0]>} : vector<1x8x8xf32>, vector<1x8x8xf32>, vector<1x8x8xf32> -> vector<1x8x8xf32>
    %cst_110 = arith.constant dense<0xFF800000> : vector<1x8xf32>
    %151 = vector.multi_reduction <maximumf>, %150, %cst_110 [2] : vector<1x8x8xf32> to vector<1x8xf32>
    %152 = vector.shape_cast %151 : vector<1x8xf32> to vector<1x8x1xf32>
    %153 = vector.broadcast %152 : vector<1x8x1xf32> to vector<1x8x8xf32>
    %154 = arith.subf %150, %153 : vector<1x8x8xf32>
    %155 = math.exp %154 : vector<1x8x8xf32>
    %cst_111 = arith.constant dense<0.000000e+00> : vector<1x8xf32>
    %156 = vector.multi_reduction <add>, %155, %cst_111 [2] : vector<1x8x8xf32> to vector<1x8xf32>
    %157 = vector.shape_cast %156 : vector<1x8xf32> to vector<1x8x1xf32>
    %158 = tpu.reciprocal %157 {approx = true} : vector<1x8x1xf32> -> vector<1x8x1xf32>
    %159 = vector.broadcast %158 : vector<1x8x1xf32> to vector<1x8x8xf32>
    %160 = arith.mulf %155, %159 : vector<1x8x8xf32>
    %cst_112 = arith.constant dense<0.000000e+00> : vector<1x8x8xf32>
    %161 = tpu.matmul %160, %149, %cst_112 {dimension_numbers = #tpu.dot_dimension_numbers<[2], [1], [1], [2], [0, 0, 0, 1, 1, 2], [0], [0]>} : vector<1x8x8xf32>, vector<1x8x8xf32>, vector<1x8x8xf32> -> vector<1x8x8xf32>
    %162 = vector.shape_cast %161 : vector<1x8x8xf32> to vector<8x8xf32>
    %c3_113 = arith.constant 3 : index
    %c0_114 = arith.constant 0 : index
    %c0_115 = arith.constant 0 : index
    %163 = vector.load %arg9[%c3_113, %c0_114, %c0_115] : memref<4x8x32xf32, #tpu.memory_space<vmem>>, vector<1x8x32xf32>
    %164 = vector.shape_cast %163 : vector<1x8x32xf32> to vector<8x32xf32>
    %cst_116 = arith.constant dense<0.000000e+00> : vector<8x32xf32>
    %165 = tpu.matmul %162, %164, %cst_116 {dimension_numbers = #tpu.dot_dimension_numbers<[1], [0], [0], [1], [0, 0, 1, 1], [], []>} : vector<8x8xf32>, vector<8x32xf32>, vector<8x32xf32> -> vector<8x32xf32>
    %166 = arith.addf %125, %165 : vector<8x32xf32>
    %c0_117 = arith.constant 0 : index
    %c0_118 = arith.constant 0 : index
    %167 = vector.load %arg10[%c0_117, %c0_118] : memref<1x32xf32, #tpu.memory_space<vmem>>, vector<1x32xf32>
    %168 = vector.broadcast %167 : vector<1x32xf32> to vector<8x32xf32>
    %169 = arith.addf %166, %168 : vector<8x32xf32>
    %170 = vector.shape_cast %169 : vector<8x32xf32> to vector<1x8x32xf32>
    %c0_119 = arith.constant 0 : index
    %c0_120 = arith.constant 0 : index
    %c0_121 = arith.constant 0 : index
    %171 = vector.load %arg11[%c0_119, %c0_120, %c0_121] : memref<1x8x32xf32, #tpu.memory_space<vmem>>, vector<1x8x32xf32>
    tpu.vector_store %arg11[%c0_119, %c0_120, %c0_121], %170 {strides = array<i32>} : memref<1x8x32xf32, #tpu.memory_space<vmem>>, vector<1x8x32xf32>,
    return
  }
  func.func @transform_0(%arg0: i32) -> (i32, i32, i32) {
    %c0_i32 = arith.constant 0 : i32
    %c0_i32_0 = arith.constant 0 : i32
    %c0_i32_1 = arith.constant 0 : i32
    return %arg0, %c0_i32, %c0_i32_0 : i32, i32, i32
  }
  func.func @transform_1(%arg0: i32) -> (i32, i32, i32) {
    %c0_i32 = arith.constant 0 : i32
    %c0_i32_0 = arith.constant 0 : i32
    %c0_i32_1 = arith.constant 0 : i32
    return %arg0, %c0_i32, %c0_i32_0 : i32, i32, i32
  }
  func.func @transform_2(%arg0: i32) -> (i32, i32, i32) {
    %c0_i32 = arith.constant 0 : i32
    %c0_i32_0 = arith.constant 0 : i32
    %c0_i32_1 = arith.constant 0 : i32
    %c0_i32_2 = arith.constant 0 : i32
    return %c0_i32, %c0_i32_0, %c0_i32_1 : i32, i32, i32
  }
  func.func @transform_3(%arg0: i32) -> (i32, i32, i32) {
    %c0_i32 = arith.constant 0 : i32
    %c0_i32_0 = arith.constant 0 : i32
    %c0_i32_1 = arith.constant 0 : i32
    %c0_i32_2 = arith.constant 0 : i32
    return %c0_i32, %c0_i32_0, %c0_i32_1 : i32, i32, i32
  }
  func.func @transform_4(%arg0: i32) -> (i32, i32, i32) {
    %c0_i32 = arith.constant 0 : i32
    %c0_i32_0 = arith.constant 0 : i32
    %c0_i32_1 = arith.constant 0 : i32
    %c0_i32_2 = arith.constant 0 : i32
    return %c0_i32, %c0_i32_0, %c0_i32_1 : i32, i32, i32
  }
  func.func @transform_5(%arg0: i32) -> (i32, i32, i32) {
    %c0_i32 = arith.constant 0 : i32
    %c0_i32_0 = arith.constant 0 : i32
    %c0_i32_1 = arith.constant 0 : i32
    %c0_i32_2 = arith.constant 0 : i32
    return %c0_i32, %c0_i32_0, %c0_i32_1 : i32, i32, i32
  }
  func.func @transform_6(%arg0: i32) -> (i32, i32, i32) {
    %c0_i32 = arith.constant 0 : i32
    %c0_i32_0 = arith.constant 0 : i32
    %c0_i32_1 = arith.constant 0 : i32
    %c0_i32_2 = arith.constant 0 : i32
    return %c0_i32, %c0_i32_0, %c0_i32_1 : i32, i32, i32
  }
  func.func @transform_7(%arg0: i32) -> (i32, i32, i32) {
    %c0_i32 = arith.constant 0 : i32
    %c0_i32_0 = arith.constant 0 : i32
    %c0_i32_1 = arith.constant 0 : i32
    %c0_i32_2 = arith.constant 0 : i32
    return %c0_i32, %c0_i32_0, %c0_i32_1 : i32, i32, i32
  }
  func.func @transform_8(%arg0: i32) -> (i32, i32, i32) {
    %c0_i32 = arith.constant 0 : i32
    %c0_i32_0 = arith.constant 0 : i32
    %c0_i32_1 = arith.constant 0 : i32
    %c0_i32_2 = arith.constant 0 : i32
    return %c0_i32, %c0_i32_0, %c0_i32_1 : i32, i32, i32
  }
  func.func @transform_9(%arg0: i32) -> (i32, i32) {
    %c0_i32 = arith.constant 0 : i32
    %c0_i32_0 = arith.constant 0 : i32
    %c0_i32_1 = arith.constant 0 : i32
    return %c0_i32, %c0_i32_0 : i32, i32
  }
  func.func @transform_10(%arg0: i32) -> (i32, i32, i32) {
    %c0_i32 = arith.constant 0 : i32
    %c0_i32_0 = arith.constant 0 : i32
    %c0_i32_1 = arith.constant 0 : i32
    return %arg0, %c0_i32, %c0_i32_0 : i32, i32, i32
  }
}

module attributes {stable_mosaic.version = 11 : i64} {
  func.func @_mha_kernel(%arg0: i32, %arg1: memref<1x8x32xf32, #tpu.memory_space<vmem>>, %arg2: memref<1x8x32xf32, #tpu.memory_space<vmem>>, %arg3: memref<4x32x8xf32, #tpu.memory_space<vmem>>, %arg4: memref<4x1x8xf32, #tpu.memory_space<vmem>>, %arg5: memref<4x32x8xf32, #tpu.memory_space<vmem>>, %arg6: memref<4x1x8xf32, #tpu.memory_space<vmem>>, %arg7: memref<4x32x8xf32, #tpu.memory_space<vmem>>, %arg8: memref<4x1x8xf32, #tpu.memory_space<vmem>>, %arg9: memref<4x8x32xf32, #tpu.memory_space<vmem>>, %arg10: memref<1x32xf32, #tpu.memory_space<vmem>>, %arg11: memref<1x8x32xf32, #tpu.memory_space<vmem>>) attributes {dimension_semantics = [#tpu.dimension_semantics<parallel>], iteration_bounds = array<i64: 2>, scalar_prefetch = 0 : i64, scratch_operands = 0 : i64, tpu.core_type = #tpu.core_type<tc>, window_params = [{transform_indices = @transform_0, window_bounds = array<i64: 1, 8, 32>}, {transform_indices = @transform_1, window_bounds = array<i64: 1, 8, 32>}, {pipeline_mode = #tpu.pipeline_mode<synchronous>, transform_indices = @transform_2, window_bounds = array<i64: 4, 32, 8>}, {pipeline_mode = #tpu.pipeline_mode<synchronous>, transform_indices = @transform_3, window_bounds = array<i64: 4, 1, 8>}, {pipeline_mode = #tpu.pipeline_mode<synchronous>, transform_indices = @transform_4, window_bounds = array<i64: 4, 32, 8>}, {pipeline_mode = #tpu.pipeline_mode<synchronous>, transform_indices = @transform_5, window_bounds = array<i64: 4, 1, 8>}, {pipeline_mode = #tpu.pipeline_mode<synchronous>, transform_indices = @transform_6, window_bounds = array<i64: 4, 32, 8>}, {pipeline_mode = #tpu.pipeline_mode<synchronous>, transform_indices = @transform_7, window_bounds = array<i64: 4, 1, 8>}, {pipeline_mode = #tpu.pipeline_mode<synchronous>, transform_indices = @transform_8, window_bounds = array<i64: 4, 8, 32>}, {pipeline_mode = #tpu.pipeline_mode<synchronous>, transform_indices = @transform_9, window_bounds = array<i64: 1, 32>}, {transform_indices = @transform_10, window_bounds = array<i64: 1, 8, 32>}]} {
    %c0 = arith.constant 0 : index
    %c0_0 = arith.constant 0 : index
    %c0_1 = arith.constant 0 : index
    %0 = vector.load %arg1[%c0, %c0_0, %c0_1] : memref<1x8x32xf32, #tpu.memory_space<vmem>>, vector<1x8x32xf32>
    %1 = vector.shape_cast %0 : vector<1x8x32xf32> to vector<8x32xf32>
    %c0_2 = arith.constant 0 : index
    %c0_3 = arith.constant 0 : index
    %c0_4 = arith.constant 0 : index
    %2 = vector.load %arg2[%c0_2, %c0_3, %c0_4] : memref<1x8x32xf32, #tpu.memory_space<vmem>>, vector<1x8x32xf32>
    %3 = vector.shape_cast %2 : vector<1x8x32xf32> to vector<8x32xf32>
    %c0_5 = arith.constant 0 : index
    %c0_6 = arith.constant 0 : index
    %c0_7 = arith.constant 0 : index
    %4 = vector.load %arg3[%c0_5, %c0_6, %c0_7] : memref<4x32x8xf32, #tpu.memory_space<vmem>>, vector<1x32x8xf32>
    %5 = vector.shape_cast %4 : vector<1x32x8xf32> to vector<32x8xf32>
    %cst = arith.constant dense<0.000000e+00> : vector<8x8xf32>
    %6 = tpu.matmul %3, %5, %cst {dimension_numbers = #tpu.dot_dimension_numbers<[1], [0], [0], [1], [0, 0, 1, 1], [], []>} : vector<8x32xf32>, vector<32x8xf32>, vector<8x8xf32> -> vector<8x8xf32>
    %c0_8 = arith.constant 0 : index
    %c0_9 = arith.constant 0 : index
    %c0_10 = arith.constant 0 : index
    %7 = vector.load %arg4[%c0_8, %c0_9, %c0_10] : memref<4x1x8xf32, #tpu.memory_space<vmem>>, vector<1x1x8xf32>
    %8 = vector.shape_cast %7 : vector<1x1x8xf32> to vector<1x8xf32>
    %9 = vector.broadcast %8 : vector<1x8xf32> to vector<8x8xf32>
    %10 = arith.addf %6, %9 : vector<8x8xf32>
    %c0_11 = arith.constant 0 : index
    %c0_12 = arith.constant 0 : index
    %c0_13 = arith.constant 0 : index
    %11 = vector.load %arg5[%c0_11, %c0_12, %c0_13] : memref<4x32x8xf32, #tpu.memory_space<vmem>>, vector<1x32x8xf32>
    %12 = vector.shape_cast %11 : vector<1x32x8xf32> to vector<32x8xf32>
    %cst_14 = arith.constant dense<0.000000e+00> : vector<8x8xf32>
    %13 = tpu.matmul %1, %12, %cst_14 {dimension_numbers = #tpu.dot_dimension_numbers<[1], [0], [0], [1], [0, 0, 1, 1], [], []>} : vector<8x32xf32>, vector<32x8xf32>, vector<8x8xf32> -> vector<8x8xf32>
    %c0_15 = arith.constant 0 : index
    %c0_16 = arith.constant 0 : index
    %c0_17 = arith.constant 0 : index
    %14 = vector.load %arg6[%c0_15, %c0_16, %c0_17] : memref<4x1x8xf32, #tpu.memory_space<vmem>>, vector<1x1x8xf32>
    %15 = vector.shape_cast %14 : vector<1x1x8xf32> to vector<1x8xf32>
    %16 = vector.broadcast %15 : vector<1x8xf32> to vector<8x8xf32>
    %17 = arith.addf %13, %16 : vector<8x8xf32>
    %c0_18 = arith.constant 0 : index
    %c0_19 = arith.constant 0 : index
    %c0_20 = arith.constant 0 : index
    %18 = vector.load %arg7[%c0_18, %c0_19, %c0_20] : memref<4x32x8xf32, #tpu.memory_space<vmem>>, vector<1x32x8xf32>
    %19 = vector.shape_cast %18 : vector<1x32x8xf32> to vector<32x8xf32>
    %cst_21 = arith.constant dense<0.000000e+00> : vector<8x8xf32>
    %20 = tpu.matmul %1, %19, %cst_21 {dimension_numbers = #tpu.dot_dimension_numbers<[1], [0], [0], [1], [0, 0, 1, 1], [], []>} : vector<8x32xf32>, vector<32x8xf32>, vector<8x8xf32> -> vector<8x8xf32>
    %c0_22 = arith.constant 0 : index
    %c0_23 = arith.constant 0 : index
    %c0_24 = arith.constant 0 : index
    %21 = vector.load %arg8[%c0_22, %c0_23, %c0_24] : memref<4x1x8xf32, #tpu.memory_space<vmem>>, vector<1x1x8xf32>
    %22 = vector.shape_cast %21 : vector<1x1x8xf32> to vector<1x8xf32>
    %23 = vector.broadcast %22 : vector<1x8xf32> to vector<8x8xf32>
    %24 = arith.addf %20, %23 : vector<8x8xf32>
    %25 = vector.shape_cast %10 : vector<8x8xf32> to vector<1x8x8xf32>
    %26 = vector.shape_cast %17 : vector<8x8xf32> to vector<1x8x8xf32>
    %27 = vector.shape_cast %24 : vector<8x8xf32> to vector<1x8x8xf32>
    %cst_25 = arith.constant dense<0.000000e+00> : vector<1x8x8xf32>
    %28 = tpu.matmul %25, %26, %cst_25 {dimension_numbers = #tpu.dot_dimension_numbers<[2], [2], [1], [1], [0, 0, 0, 1, 1, 1], [0], [0]>} : vector<1x8x8xf32>, vector<1x8x8xf32>, vector<1x8x8xf32> -> vector<1x8x8xf32>
    %cst_26 = arith.constant dense<0xFF800000> : vector<1x8xf32>
    %29 = vector.multi_reduction <maximumf>, %28, %cst_26 [2] : vector<1x8x8xf32> to vector<1x8xf32>
    %30 = vector.shape_cast %29 : vector<1x8xf32> to vector<1x8x1xf32>
    %31 = vector.broadcast %30 : vector<1x8x1xf32> to vector<1x8x8xf32>
    %32 = arith.subf %28, %31 : vector<1x8x8xf32>
    %33 = math.exp %32 : vector<1x8x8xf32>
    %cst_27 = arith.constant dense<0.000000e+00> : vector<1x8xf32>
    %34 = vector.multi_reduction <add>, %33, %cst_27 [2] : vector<1x8x8xf32> to vector<1x8xf32>
    %35 = vector.shape_cast %34 : vector<1x8xf32> to vector<1x8x1xf32>
    %36 = tpu.reciprocal %35 {approx = true} : vector<1x8x1xf32> -> vector<1x8x1xf32>
    %37 = vector.broadcast %36 : vector<1x8x1xf32> to vector<1x8x8xf32>
    %38 = arith.mulf %33, %37 : vector<1x8x8xf32>
    %cst_28 = arith.constant dense<0.000000e+00> : vector<1x8x8xf32>
    %39 = tpu.matmul %38, %27, %cst_28 {dimension_numbers = #tpu.dot_dimension_numbers<[2], [1], [1], [2], [0, 0, 0, 1, 1, 2], [0], [0]>} : vector<1x8x8xf32>, vector<1x8x8xf32>, vector<1x8x8xf32> -> vector<1x8x8xf32>
    %40 = vector.shape_cast %39 : vector<1x8x8xf32> to vector<8x8xf32>
    %c0_29 = arith.constant 0 : index
    %c0_30 = arith.constant 0 : index
    %c0_31 = arith.constant 0 : index
    %41 = vector.load %arg9[%c0_29, %c0_30, %c0_31] : memref<4x8x32xf32, #tpu.memory_space<vmem>>, vector<1x8x32xf32>
    %42 = vector.shape_cast %41 : vector<1x8x32xf32> to vector<8x32xf32>
    %cst_32 = arith.constant dense<0.000000e+00> : vector<8x32xf32>
    %43 = tpu.matmul %40, %42, %cst_32 {dimension_numbers = #tpu.dot_dimension_numbers<[1], [0], [0], [1], [0, 0, 1, 1], [], []>} : vector<8x8xf32>, vector<8x32xf32>, vector<8x32xf32> -> vector<8x32xf32>
    %c1 = arith.constant 1 : index
    %c0_33 = arith.constant 0 : index
    %c0_34 = arith.constant 0 : index
    %44 = vector.load %arg3[%c1, %c0_33, %c0_34] : memref<4x32x8xf32, #tpu.memory_space<vmem>>, vector<1x32x8xf32>
    %45 = vector.shape_cast %44 : vector<1x32x8xf32> to vector<32x8xf32>
    %cst_35 = arith.constant dense<0.000000e+00> : vector<8x8xf32>
    %46 = tpu.matmul %3, %45, %cst_35 {dimension_numbers = #tpu.dot_dimension_numbers<[1], [0], [0], [1], [0, 0, 1, 1], [], []>} : vector<8x32xf32>, vector<32x8xf32>, vector<8x8xf32> -> vector<8x8xf32>
    %c1_36 = arith.constant 1 : index
    %c0_37 = arith.constant 0 : index
    %c0_38 = arith.constant 0 : index
    %47 = vector.load %arg4[%c1_36, %c0_37, %c0_38] : memref<4x1x8xf32, #tpu.memory_space<vmem>>, vector<1x1x8xf32>
    %48 = vector.shape_cast %47 : vector<1x1x8xf32> to vector<1x8xf32>
    %49 = vector.broadcast %48 : vector<1x8xf32> to vector<8x8xf32>
    %50 = arith.addf %46, %49 : vector<8x8xf32>
    %c1_39 = arith.constant 1 : index
    %c0_40 = arith.constant 0 : index
    %c0_41 = arith.constant 0 : index
    %51 = vector.load %arg5[%c1_39, %c0_40, %c0_41] : memref<4x32x8xf32, #tpu.memory_space<vmem>>, vector<1x32x8xf32>
    %52 = vector.shape_cast %51 : vector<1x32x8xf32> to vector<32x8xf32>
    %cst_42 = arith.constant dense<0.000000e+00> : vector<8x8xf32>
    %53 = tpu.matmul %1, %52, %cst_42 {dimension_numbers = #tpu.dot_dimension_numbers<[1], [0], [0], [1], [0, 0, 1, 1], [], []>} : vector<8x32xf32>, vector<32x8xf32>, vector<8x8xf32> -> vector<8x8xf32>
    %c1_43 = arith.constant 1 : index
    %c0_44 = arith.constant 0 : index
    %c0_45 = arith.constant 0 : index
    %54 = vector.load %arg6[%c1_43, %c0_44, %c0_45] : memref<4x1x8xf32, #tpu.memory_space<vmem>>, vector<1x1x8xf32>
    %55 = vector.shape_cast %54 : vector<1x1x8xf32> to vector<1x8xf32>
    %56 = vector.broadcast %55 : vector<1x8xf32> to vector<8x8xf32>
    %57 = arith.addf %53, %56 : vector<8x8xf32>
    %c1_46 = arith.constant 1 : index
    %c0_47 = arith.constant 0 : index
    %c0_48 = arith.constant 0 : index
    %58 = vector.load %arg7[%c1_46, %c0_47, %c0_48] : memref<4x32x8xf32, #tpu.memory_space<vmem>>, vector<1x32x8xf32>
    %59 = vector.shape_cast %58 : vector<1x32x8xf32> to vector<32x8xf32>
    %cst_49 = arith.constant dense<0.000000e+00> : vector<8x8xf32>
    %60 = tpu.matmul %1, %59, %cst_49 {dimension_numbers = #tpu.dot_dimension_numbers<[1], [0], [0], [1], [0, 0, 1, 1], [], []>} : vector<8x32xf32>, vector<32x8xf32>, vector<8x8xf32> -> vector<8x8xf32>
    %c1_50 = arith.constant 1 : index
    %c0_51 = arith.constant 0 : index
    %c0_52 = arith.constant 0 : index
    %61 = vector.load %arg8[%c1_50, %c0_51, %c0_52] : memref<4x1x8xf32, #tpu.memory_space<vmem>>, vector<1x1x8xf32>
    %62 = vector.shape_cast %61 : vector<1x1x8xf32> to vector<1x8xf32>
    %63 = vector.broadcast %62 : vector<1x8xf32> to vector<8x8xf32>
    %64 = arith.addf %60, %63 : vector<8x8xf32>
    %65 = vector.shape_cast %50 : vector<8x8xf32> to vector<1x8x8xf32>
    %66 = vector.shape_cast %57 : vector<8x8xf32> to vector<1x8x8xf32>
    %67 = vector.shape_cast %64 : vector<8x8xf32> to vector<1x8x8xf32>
    %cst_53 = arith.constant dense<0.000000e+00> : vector<1x8x8xf32>
    %68 = tpu.matmul %65, %66, %cst_53 {dimension_numbers = #tpu.dot_dimension_numbers<[2], [2], [1], [1], [0, 0, 0, 1, 1, 1], [0], [0]>} : vector<1x8x8xf32>, vector<1x8x8xf32>, vector<1x8x8xf32> -> vector<1x8x8xf32>
    %cst_54 = arith.constant dense<0xFF800000> : vector<1x8xf32>
    %69 = vector.multi_reduction <maximumf>, %68, %cst_54 [2] : vector<1x8x8xf32> to vector<1x8xf32>
    %70 = vector.shape_cast %69 : vector<1x8xf32> to vector<1x8x1xf32>
    %71 = vector.broadcast %70 : vector<1x8x1xf32> to vector<1x8x8xf32>
    %72 = arith.subf %68, %71 : vector<1x8x8xf32>
    %73 = math.exp %72 : vector<1x8x8xf32>
    %cst_55 = arith.constant dense<0.000000e+00> : vector<1x8xf32>
    %74 = vector.multi_reduction <add>, %73, %cst_55 [2] : vector<1x8x8xf32> to vector<1x8xf32>
    %75 = vector.shape_cast %74 : vector<1x8xf32> to vector<1x8x1xf32>
    %76 = tpu.reciprocal %75 {approx = true} : vector<1x8x1xf32> -> vector<1x8x1xf32>
    %77 = vector.broadcast %76 : vector<1x8x1xf32> to vector<1x8x8xf32>
    %78 = arith.mulf %73, %77 : vector<1x8x8xf32>
    %cst_56 = arith.constant dense<0.000000e+00> : vector<1x8x8xf32>
    %79 = tpu.matmul %78, %67, %cst_56 {dimension_numbers = #tpu.dot_dimension_numbers<[2], [1], [1], [2], [0, 0, 0, 1, 1, 2], [0], [0]>} : vector<1x8x8xf32>, vector<1x8x8xf32>, vector<1x8x8xf32> -> vector<1x8x8xf32>
    %80 = vector.shape_cast %79 : vector<1x8x8xf32> to vector<8x8xf32>
    %c1_57 = arith.constant 1 : index
    %c0_58 = arith.constant 0 : index
    %c0_59 = arith.constant 0 : index
    %81 = vector.load %arg9[%c1_57, %c0_58, %c0_59] : memref<4x8x32xf32, #tpu.memory_space<vmem>>, vector<1x8x32xf32>
    %82 = vector.shape_cast %81 : vector<1x8x32xf32> to vector<8x32xf32>
    %cst_60 = arith.constant dense<0.000000e+00> : vector<8x32xf32>
    %83 = tpu.matmul %80, %82, %cst_60 {dimension_numbers = #tpu.dot_dimension_numbers<[1], [0], [0], [1], [0, 0, 1, 1], [], []>} : vector<8x8xf32>, vector<8x32xf32>, vector<8x32xf32> -> vector<8x32xf32>
    %84 = arith.addf %43, %83 : vector<8x32xf32>
    %c2 = arith.constant 2 : index
    %c0_61 = arith.constant 0 : index
    %c0_62 = arith.constant 0 : index
    %85 = vector.load %arg3[%c2, %c0_61, %c0_62] : memref<4x32x8xf32, #tpu.memory_space<vmem>>, vector<1x32x8xf32>
    %86 = vector.shape_cast %85 : vector<1x32x8xf32> to vector<32x8xf32>
    %cst_63 = arith.constant dense<0.000000e+00> : vector<8x8xf32>
    %87 = tpu.matmul %3, %86, %cst_63 {dimension_numbers = #tpu.dot_dimension_numbers<[1], [0], [0], [1], [0, 0, 1, 1], [], []>} : vector<8x32xf32>, vector<32x8xf32>, vector<8x8xf32> -> vector<8x8xf32>
    %c2_64 = arith.constant 2 : index
    %c0_65 = arith.constant 0 : index
    %c0_66 = arith.constant 0 : index
    %88 = vector.load %arg4[%c2_64, %c0_65, %c0_66] : memref<4x1x8xf32, #tpu.memory_space<vmem>>, vector<1x1x8xf32>
    %89 = vector.shape_cast %88 : vector<1x1x8xf32> to vector<1x8xf32>
    %90 = vector.broadcast %89 : vector<1x8xf32> to vector<8x8xf32>
    %91 = arith.addf %87, %90 : vector<8x8xf32>
    %c2_67 = arith.constant 2 : index
    %c0_68 = arith.constant 0 : index
    %c0_69 = arith.constant 0 : index
    %92 = vector.load %arg5[%c2_67, %c0_68, %c0_69] : memref<4x32x8xf32, #tpu.memory_space<vmem>>, vector<1x32x8xf32>
    %93 = vector.shape_cast %92 : vector<1x32x8xf32> to vector<32x8xf32>
    %cst_70 = arith.constant dense<0.000000e+00> : vector<8x8xf32>
    %94 = tpu.matmul %1, %93, %cst_70 {dimension_numbers = #tpu.dot_dimension_numbers<[1], [0], [0], [1], [0, 0, 1, 1], [], []>} : vector<8x32xf32>, vector<32x8xf32>, vector<8x8xf32> -> vector<8x8xf32>
    %c2_71 = arith.constant 2 : index
    %c0_72 = arith.constant 0 : index
    %c0_73 = arith.constant 0 : index
    %95 = vector.load %arg6[%c2_71, %c0_72, %c0_73] : memref<4x1x8xf32, #tpu.memory_space<vmem>>, vector<1x1x8xf32>
    %96 = vector.shape_cast %95 : vector<1x1x8xf32> to vector<1x8xf32>
    %97 = vector.broadcast %96 : vector<1x8xf32> to vector<8x8xf32>
    %98 = arith.addf %94, %97 : vector<8x8xf32>
    %c2_74 = arith.constant 2 : index
    %c0_75 = arith.constant 0 : index
    %c0_76 = arith.constant 0 : index
    %99 = vector.load %arg7[%c2_74, %c0_75, %c0_76] : memref<4x32x8xf32, #tpu.memory_space<vmem>>, vector<1x32x8xf32>
    %100 = vector.shape_cast %99 : vector<1x32x8xf32> to vector<32x8xf32>
    %cst_77 = arith.constant dense<0.000000e+00> : vector<8x8xf32>
    %101 = tpu.matmul %1, %100, %cst_77 {dimension_numbers = #tpu.dot_dimension_numbers<[1], [0], [0], [1], [0, 0, 1, 1], [], []>} : vector<8x32xf32>, vector<32x8xf32>, vector<8x8xf32> -> vector<8x8xf32>
    %c2_78 = arith.constant 2 : index
    %c0_79 = arith.constant 0 : index
    %c0_80 = arith.constant 0 : index
    %102 = vector.load %arg8[%c2_78, %c0_79, %c0_80] : memref<4x1x8xf32, #tpu.memory_space<vmem>>, vector<1x1x8xf32>
    %103 = vector.shape_cast %102 : vector<1x1x8xf32> to vector<1x8xf32>
    %104 = vector.broadcast %103 : vector<1x8xf32> to vector<8x8xf32>
    %105 = arith.addf %101, %104 : vector<8x8xf32>
    %106 = vector.shape_cast %91 : vector<8x8xf32> to vector<1x8x8xf32>
    %107 = vector.shape_cast %98 : vector<8x8xf32> to vector<1x8x8xf32>
    %108 = vector.shape_cast %105 : vector<8x8xf32> to vector<1x8x8xf32>
    %cst_81 = arith.constant dense<0.000000e+00> : vector<1x8x8xf32>
    %109 = tpu.matmul %106, %107, %cst_81 {dimension_numbers = #tpu.dot_dimension_numbers<[2], [2], [1], [1], [0, 0, 0, 1, 1, 1], [0], [0]>} : vector<1x8x8xf32>, vector<1x8x8xf32>, vector<1x8x8xf32> -> vector<1x8x8xf32>
    %cst_82 = arith.constant dense<0xFF800000> : vector<1x8xf32>
    %110 = vector.multi_reduction <maximumf>, %109, %cst_82 [2] : vector<1x8x8xf32> to vector<1x8xf32>
    %111 = vector.shape_cast %110 : vector<1x8xf32> to vector<1x8x1xf32>
    %112 = vector.broadcast %111 : vector<1x8x1xf32> to vector<1x8x8xf32>
    %113 = arith.subf %109, %112 : vector<1x8x8xf32>
    %114 = math.exp %113 : vector<1x8x8xf32>
    %cst_83 = arith.constant dense<0.000000e+00> : vector<1x8xf32>
    %115 = vector.multi_reduction <add>, %114, %cst_83 [2] : vector<1x8x8xf32> to vector<1x8xf32>
    %116 = vector.shape_cast %115 : vector<1x8xf32> to vector<1x8x1xf32>
    %117 = tpu.reciprocal %116 {approx = true} : vector<1x8x1xf32> -> vector<1x8x1xf32>
    %118 = vector.broadcast %117 : vector<1x8x1xf32> to vector<1x8x8xf32>
    %119 = arith.mulf %114, %118 : vector<1x8x8xf32>
    %cst_84 = arith.constant dense<0.000000e+00> : vector<1x8x8xf32>
    %120 = tpu.matmul %119, %108, %cst_84 {dimension_numbers = #tpu.dot_dimension_numbers<[2], [1], [1], [2], [0, 0, 0, 1, 1, 2], [0], [0]>} : vector<1x8x8xf32>, vector<1x8x8xf32>, vector<1x8x8xf32> -> vector<1x8x8xf32>
    %121 = vector.shape_cast %120 : vector<1x8x8xf32> to vector<8x8xf32>
    %c2_85 = arith.constant 2 : index
    %c0_86 = arith.constant 0 : index
    %c0_87 = arith.constant 0 : index
    %122 = vector.load %arg9[%c2_85, %c0_86, %c0_87] : memref<4x8x32xf32, #tpu.memory_space<vmem>>, vector<1x8x32xf32>
    %123 = vector.shape_cast %122 : vector<1x8x32xf32> to vector<8x32xf32>
    %cst_88 = arith.constant dense<0.000000e+00> : vector<8x32xf32>
    %124 = tpu.matmul %121, %123, %cst_88 {dimension_numbers = #tpu.dot_dimension_numbers<[1], [0], [0], [1], [0, 0, 1, 1], [], []>} : vector<8x8xf32>, vector<8x32xf32>, vector<8x32xf32> -> vector<8x32xf32>
    %125 = arith.addf %84, %124 : vector<8x32xf32>
    %c3 = arith.constant 3 : index
    %c0_89 = arith.constant 0 : index
    %c0_90 = arith.constant 0 : index
    %126 = vector.load %arg3[%c3, %c0_89, %c0_90] : memref<4x32x8xf32, #tpu.memory_space<vmem>>, vector<1x32x8xf32>
    %127 = vector.shape_cast %126 : vector<1x32x8xf32> to vector<32x8xf32>
    %cst_91 = arith.constant dense<0.000000e+00> : vector<8x8xf32>
    %128 = tpu.matmul %3, %127, %cst_91 {dimension_numbers = #tpu.dot_dimension_numbers<[1], [0], [0], [1], [0, 0, 1, 1], [], []>} : vector<8x32xf32>, vector<32x8xf32>, vector<8x8xf32> -> vector<8x8xf32>
    %c3_92 = arith.constant 3 : index
    %c0_93 = arith.constant 0 : index
    %c0_94 = arith.constant 0 : index
    %129 = vector.load %arg4[%c3_92, %c0_93, %c0_94] : memref<4x1x8xf32, #tpu.memory_space<vmem>>, vector<1x1x8xf32>
    %130 = vector.shape_cast %129 : vector<1x1x8xf32> to vector<1x8xf32>
    %131 = vector.broadcast %130 : vector<1x8xf32> to vector<8x8xf32>
    %132 = arith.addf %128, %131 : vector<8x8xf32>
    %c3_95 = arith.constant 3 : index
    %c0_96 = arith.constant 0 : index
    %c0_97 = arith.constant 0 : index
    %133 = vector.load %arg5[%c3_95, %c0_96, %c0_97] : memref<4x32x8xf32, #tpu.memory_space<vmem>>, vector<1x32x8xf32>
    %134 = vector.shape_cast %133 : vector<1x32x8xf32> to vector<32x8xf32>
    %cst_98 = arith.constant dense<0.000000e+00> : vector<8x8xf32>
    %135 = tpu.matmul %1, %134, %cst_98 {dimension_numbers = #tpu.dot_dimension_numbers<[1], [0], [0], [1], [0, 0, 1, 1], [], []>} : vector<8x32xf32>, vector<32x8xf32>, vector<8x8xf32> -> vector<8x8xf32>
    %c3_99 = arith.constant 3 : index
    %c0_100 = arith.constant 0 : index
    %c0_101 = arith.constant 0 : index
    %136 = vector.load %arg6[%c3_99, %c0_100, %c0_101] : memref<4x1x8xf32, #tpu.memory_space<vmem>>, vector<1x1x8xf32>
    %137 = vector.shape_cast %136 : vector<1x1x8xf32> to vector<1x8xf32>
    %138 = vector.broadcast %137 : vector<1x8xf32> to vector<8x8xf32>
    %139 = arith.addf %135, %138 : vector<8x8xf32>
    %c3_102 = arith.constant 3 : index
    %c0_103 = arith.constant 0 : index
    %c0_104 = arith.constant 0 : index
    %140 = vector.load %arg7[%c3_102, %c0_103, %c0_104] : memref<4x32x8xf32, #tpu.memory_space<vmem>>, vector<1x32x8xf32>
    %141 = vector.shape_cast %140 : vector<1x32x8xf32> to vector<32x8xf32>
    %cst_105 = arith.constant dense<0.000000e+00> : vector<8x8xf32>
    %142 = tpu.matmul %1, %141, %cst_105 {dimension_numbers = #tpu.dot_dimension_numbers<[1], [0], [0], [1], [0, 0, 1, 1], [], []>} : vector<8x32xf32>, vector<32x8xf32>, vector<8x8xf32> -> vector<8x8xf32>
    %c3_106 = arith.constant 3 : index
    %c0_107 = arith.constant 0 : index
    %c0_108 = arith.constant 0 : index
    %143 = vector.load %arg8[%c3_106, %c0_107, %c0_108] : memref<4x1x8xf32, #tpu.memory_space<vmem>>, vector<1x1x8xf32>
    %144 = vector.shape_cast %143 : vector<1x1x8xf32> to vector<1x8xf32>
    %145 = vector.broadcast %144 : vector<1x8xf32> to vector<8x8xf32>
    %146 = arith.addf %142, %145 : vector<8x8xf32>
    %147 = vector.shape_cast %132 : vector<8x8xf32> to vector<1x8x8xf32>
    %148 = vector.shape_cast %139 : vector<8x8xf32> to vector<1x8x8xf32>
    %149 = vector.shape_cast %146 : vector<8x8xf32> to vector<1x8x8xf32>
    %cst_109 = arith.constant dense<0.000000e+00> : vector<1x8x8xf32>
    %150 = tpu.matmul %147, %148, %cst_109 {dimension_numbers = #tpu.dot_dimension_numbers<[2], [2], [1], [1], [0, 0, 0, 1, 1, 1], [0], [0]>} : vector<1x8x8xf32>, vector<1x8x8xf32>, vector<1x8x8xf32> -> vector<1x8x8xf32>
    %cst_110 = arith.constant dense<0xFF800000> : vector<1x8xf32>
    %151 = vector.multi_reduction <maximumf>, %150, %cst_110 [2] : vector<1x8x8xf32> to vector<1x8xf32>
    %152 = vector.shape_cast %151 : vector<1x8xf32> to vector<1x8x1xf32>
    %153 = vector.broadcast %152 : vector<1x8x1xf32> to vector<1x8x8xf32>
    %154 = arith.subf %150, %153 : vector<1x8x8xf32>
    %155 = math.exp %154 : vector<1x8x8xf32>
    %cst_111 = arith.constant dense<0.000000e+00> : vector<1x8xf32>
    %156 = vector.multi_reduction <add>, %155, %cst_111 [2] : vector<1x8x8xf32> to vector<1x8xf32>
    %157 = vector.shape_cast %156 : vector<1x8xf32> to vector<1x8x1xf32>
    %158 = tpu.reciprocal %157 {approx = true} : vector<1x8x1xf32> -> vector<1x8x1xf32>
    %159 = vector.broadcast %158 : vector<1x8x1xf32> to vector<1x8x8xf32>
    %160 = arith.mulf %155, %159 : vector<1x8x8xf32>
    %cst_112 = arith.constant dense<0.000000e+00> : vector<1x8x8xf32>
    %161 = tpu.matmul %160, %149, %cst_112 {dimension_numbers = #tpu.dot_dimension_numbers<[2], [1], [1], [2], [0, 0, 0, 1, 1, 2], [0], [0]>} : vector<1x8x8xf32>, vector<1x8x8xf32>, vector<1x8x8xf32> -> vector<1x8x8xf32>
    %162 = vector.shape_cast %161 : vector<1x8x8xf32> to vector<8x8xf32>
    %c3_113 = arith.constant 3 : index
    %c0_114 = arith.constant 0 : index
    %c0_115 = arith.constant 0 : index
    %163 = vector.load %arg9[%c3_113, %c0_114, %c0_115] : memref<4x8x32xf32, #tpu.memory_space<vmem>>, vector<1x8x32xf32>
    %164 = vector.shape_cast %163 : vector<1x8x32xf32> to vector<8x32xf32>
    %cst_116 = arith.constant dense<0.000000e+00> : vector<8x32xf32>
    %165 = tpu.matmul %162, %164, %cst_116 {dimension_numbers = #tpu.dot_dimension_numbers<[1], [0], [0], [1], [0, 0, 1, 1], [], []>} : vector<8x8xf32>, vector<8x32xf32>, vector<8x32xf32> -> vector<8x32xf32>
    %166 = arith.addf %125, %165 : vector<8x32xf32>
    %c0_117 = arith.constant 0 : index
    %c0_118 = arith.constant 0 : index
    %167 = vector.load %arg10[%c0_117, %c0_118] : memref<1x32xf32, #tpu.memory_space<vmem>>, vector<1x32xf32>
    %168 = vector.broadcast %167 : vector<1x32xf32> to vector<8x32xf32>
    %169 = arith.addf %166, %168 : vector<8x32xf32>
    %170 = vector.shape_cast %169 : vector<8x32xf32> to vector<1x8x32xf32>
    %c0_119 = arith.constant 0 : index
    %c0_120 = arith.constant 0 : index
    %c0_121 = arith.constant 0 : index
    %171 = vector.load %arg11[%c0_119, %c0_120, %c0_121] : memref<1x8x32xf32, #tpu.memory_space<vmem>>, vector<1x8x32xf32>
    tpu.vector_store %arg11[%c0_119, %c0_120, %c0_121], %170 {strides = array<i32>} : memref<1x8x32xf32, #tpu.memory_space<vmem>>, vector<1x8x32xf32>,
    return
  }
  func.func @transform_0(%arg0: i32) -> (i32, i32, i32) {
    %c0_i32 = arith.constant 0 : i32
    %c0_i32_0 = arith.constant 0 : i32
    %c0_i32_1 = arith.constant 0 : i32
    return %arg0, %c0_i32, %c0_i32_0 : i32, i32, i32
  }
  func.func @transform_1(%arg0: i32) -> (i32, i32, i32) {
    %c0_i32 = arith.constant 0 : i32
    %c0_i32_0 = arith.constant 0 : i32
    %c0_i32_1 = arith.constant 0 : i32
    return %arg0, %c0_i32, %c0_i32_0 : i32, i32, i32
  }
  func.func @transform_2(%arg0: i32) -> (i32, i32, i32) {
    %c0_i32 = arith.constant 0 : i32
    %c0_i32_0 = arith.constant 0 : i32
    %c0_i32_1 = arith.constant 0 : i32
    %c0_i32_2 = arith.constant 0 : i32
    return %c0_i32, %c0_i32_0, %c0_i32_1 : i32, i32, i32
  }
  func.func @transform_3(%arg0: i32) -> (i32, i32, i32) {
    %c0_i32 = arith.constant 0 : i32
    %c0_i32_0 = arith.constant 0 : i32
    %c0_i32_1 = arith.constant 0 : i32
    %c0_i32_2 = arith.constant 0 : i32
    return %c0_i32, %c0_i32_0, %c0_i32_1 : i32, i32, i32
  }
  func.func @transform_4(%arg0: i32) -> (i32, i32, i32) {
    %c0_i32 = arith.constant 0 : i32
    %c0_i32_0 = arith.constant 0 : i32
    %c0_i32_1 = arith.constant 0 : i32
    %c0_i32_2 = arith.constant 0 : i32
    return %c0_i32, %c0_i32_0, %c0_i32_1 : i32, i32, i32
  }
  func.func @transform_5(%arg0: i32) -> (i32, i32, i32) {
    %c0_i32 = arith.constant 0 : i32
    %c0_i32_0 = arith.constant 0 : i32
    %c0_i32_1 = arith.constant 0 : i32
    %c0_i32_2 = arith.constant 0 : i32
    return %c0_i32, %c0_i32_0, %c0_i32_1 : i32, i32, i32
  }
  func.func @transform_6(%arg0: i32) -> (i32, i32, i32) {
    %c0_i32 = arith.constant 0 : i32
    %c0_i32_0 = arith.constant 0 : i32
    %c0_i32_1 = arith.constant 0 : i32
    %c0_i32_2 = arith.constant 0 : i32
    return %c0_i32, %c0_i32_0, %c0_i32_1 : i32, i32, i32
  }
  func.func @transform_7(%arg0: i32) -> (i32, i32, i32) {
    %c0_i32 = arith.constant 0 : i32
    %c0_i32_0 = arith.constant 0 : i32
    %c0_i32_1 = arith.constant 0 : i32
    %c0_i32_2 = arith.constant 0 : i32
    return %c0_i32, %c0_i32_0, %c0_i32_1 : i32, i32, i32
  }
  func.func @transform_8(%arg0: i32) -> (i32, i32, i32) {
    %c0_i32 = arith.constant 0 : i32
    %c0_i32_0 = arith.constant 0 : i32
    %c0_i32_1 = arith.constant 0 : i32
    %c0_i32_2 = arith.constant 0 : i32
    return %c0_i32, %c0_i32_0, %c0_i32_1 : i32, i32, i32
  }
  func.func @transform_9(%arg0: i32) -> (i32, i32) {
    %c0_i32 = arith.constant 0 : i32
    %c0_i32_0 = arith.constant 0 : i32
    %c0_i32_1 = arith.constant 0 : i32
    return %c0_i32, %c0_i32_0 : i32, i32
  }
  func.func @transform_10(%arg0: i32) -> (i32, i32, i32) {
    %c0_i32 = arith.constant 0 : i32
    %c0_i32_0 = arith.constant 0 : i32
    %c0_i32_1 = arith.constant 0 : i32
    return %arg0, %c0_i32, %c0_i32_0 : i32, i32, i32
  }
}

</mosaic_0001>

<bundles_post_ra>
// kernel: tpu_custom_call.1
= control target key start
LH: loop header
LB: loop body
LE: loop exit
PB: predicated region body
PF: predicated region fallthrough
CT: control target
= control target key end

     0   :  { %15 = vsyncpa [#allocation3], 0  ;;  %s3474_s0 = inlined_call_operand.vmem [shape: f32[2,8,32], index: 0, kind: input, shape index: {}]   ;;  %s3475_s1 = inlined_call_operand.vmem [shape: f32[2,8,32], index: 1, kind: input, shape index: {}]   ;;  %s3476_s2 = inlined_call_operand.vmem [shape: f32[4,32,8], index: 2, kind: input, shape index: {}]   ;;  %s3477_s3 = inlined_call_operand.vmem [shape: f32[4,1,8], index: 3, kind: input, shape index: {}]   ;;  %s3478_s4 = inlined_call_operand.vmem [shape: f32[4,32,8], index: 4, kind: input, shape index: {}]   ;;  %s3479_s5 = inlined_call_operand.vmem [shape: f32[4,1,8], index: 5, kind: input, shape index: {}]   ;;  %s3480_s6 = inlined_call_operand.vmem [shape: f32[4,32,8], index: 6, kind: input, shape index: {}]   ;;  %s3481_s7 = inlined_call_operand.vmem [shape: f32[4,1,8], index: 7, kind: input, shape index: {}]   ;;  %s3482_s8 = inlined_call_operand.vmem [shape: f32[4,8,32], index: 8, kind: input, shape index: {}]   ;;  %s3483_s9 = inlined_call_operand.vmem [shape: f32[1,32], index: 9, kind: input, shape index: {}]   ;;  %s3484_s10 = inlined_call_operand.hbm [shape: f32[2,8,32], index: 10, kind: output, shape index: {}]  }
   0x1   :  { %17 = vsyncpa [#allocation3 + $0x1], 0  ;;  %s3036_s13 = smov 0   ;;  %s3038_s14 = smov 0  }
   0x2   :  { %s3040_s15 = smov 0   ;;  %s3042_s16 = smov 0  }
   0x3 LB: > { %s3057_s17 = sadd.s32 4294967295, %s2975_s16   ;;  %s2407_s18 = sadd.s32 4294967294, %s2975_s16   ;;  %s2975_s16 = sphi %s3042_s16, %s3490_s16   ;;  %s2971_s15 = sphi %s3040_s15, %s3489_s15   ;;  %s2967_s14 = sphi %s3038_s14, %s3488_s14   ;;  %s2963_s13 = sphi %s3036_s13, %s3487_s13  }
   0x4   : > { %s3061_s19 = sadd.s32 1, %s2975_s16   ;;  %s250_s20 = sadd.s32 1, %s2971_s15 }
   0x5   : > { %s247_s21 = ssub.s32 %s2975_s16, %s3061_s19  ;;  %p260_p0 = scmp.ne.s32.totalorder %s2971_s15, %s2967_s14 }
   0x6   : > { %p248_p1 = scmp.eq.s32.totalorder %s247_s21, 0  ;;  %p261_p2 = scmp.eq.s32.totalorder %s3057_s17, 1 }
   0x7   : > { %p266_p3 = scmp.ne.s32.totalorder %s2967_s14, %s2963_s13  ;;  %p267_p4 = scmp.eq.s32.totalorder %s2407_s18, 1 }
   0x8   : > { %s3072_s22 = scalar_select %p248_p1, %s2971_s15, %s250_s20  }
   0x9   : > { %p3074_p5 = por %p261_p2, %p260_p0  ;;  %p3078_p6 = por %p267_p4, %p266_p3 }
   0xa   : > { %p2410_p7 = scmp.ge.s32.totalorder %s2975_s16, 1  ;;  %p323_p8 = scmp.lt.s32.totalorder %s2975_s16, 3 }
   0xc   : > { %p324_p9 = pnand %p2410_p7, %p323_p8 }
   0xd   : > { %v459_v0 = vld [vmem:[%s3478_s4] sm:$0xff] (!%p324_p9)  ;;  %v460_v1 = vld [vmem:[%s3478_s4 + $0x8] sm:$0xff] (!%p324_p9)  ;;  %v2977_v3 = vmov (!%p324_p9), 0.0|0.0   ;;  %v461_v6 = vld [vmem:[%s3478_s4 + $0x10] sm:$0xff] (!%p324_p9)  ;;  %p364_p10 = scmp.lt.s32.totalorder (!%p324_p9), %s3057_s17, 1  ;;  %vm2978_vm0 = vmmov (!%p324_p9), 0  }
   0xe   : > { %327 = sbr.rel (%p324_p9) target bundleno = 3885 (0xf2d), region = 60  ;;  %v374_v2 = vld [vmem:[%s3476_s2] sm:$0xff] (!%p324_p9)  ;;  %2789 = vmatprep.subr.bf16.mxu1 (!%p324_p9), %v2977_v3  ;;  %v2790_v4 = vpack.c.bf16 (!%p324_p9), %v460_v1, %v459_v0  ;;  %2783 = vmatprep.subr.bf16.mxu0 (!%p324_p9), %v2977_v3  ;;  %v375_v5 = vld [vmem:[%s3476_s2 + $0x8] sm:$0xff] (!%p324_p9)  ;;  %v462_v7 = vld [vmem:[%s3478_s4 + $0x18] sm:$0xff] (!%p324_p9)  ;;  %v2979_v11 = vmov (!%p324_p9), 0.0   ;;  %vm385_vm1 = vcmask (!%p324_p9), 261120  }
   0xf   : > { %v2784_v8 = vpack.c.bf16 (!%p324_p9), %v375_v5, %v374_v2  ;;  %v376_v9 = vld [vmem:[%s3476_s2 + $0x10] sm:$0xff] (!%p324_p9)  ;;  %v377_v10 = vld [vmem:[%s3476_s2 + $0x18] sm:$0xff] (!%p324_p9)  ;;  %2610 = vmatprep.mubr.msk.f32.mxu1 (!%p324_p9), %vm2978_vm0, %v2979_v11  ;;  %2599 = vmatprep.mubr.msk.f32.mxu0 (!%p324_p9), %vm2978_vm0, %v2979_v11  ;;  %v2793_v12 = vpack.c.bf16 (!%p324_p9), %v462_v7, %v461_v6  ;;  %v2416_v16 = vld [vmem:[%s3479_s5] ss:$0 sm:$0xff] (!%p324_p9)  ;;  %vm624_vm2 = vcmask (!%p324_p9), 64512   ;;  %s361_s29 = sand.u32 (!%p324_p9), 1, %s2967_s14  }
  0x10   : > { %2791 = vmatpush3.bf16.msra.mxu1 (!%p324_p9), %v2790_v4  ;;  %v2787_v13 = vpack.c.bf16 (!%p324_p9), %v377_v10, %v376_v9  ;;  %v2414_v17 = vld [vmem:[%s3477_s3] ss:$0 sm:$0xff] (!%p324_p9)  ;;  %v544_v25 = vld [vmem:[%s3480_s6 + $0x8] sm:$0xff] (!%p324_p9)  ;;  %v545_v26 = vld [vmem:[%s3480_s6 + $0x10] sm:$0xff] (!%p324_p9)  ;;  %s2504_s18 = sshll.u32 (!%p324_p9), %s3057_s17, 7  ;;  %s2323_s28 = scalar_lea.sflag (!%p324_p9), [#allocation3], %s361_s29 }
  0x11   : > { %2785 = vmatpush3.bf16.msra.mxu0 (!%p324_p9), %v2784_v8  ;;  %2792 = vmatprep.subr.bf16.mxu1 (!%p324_p9), %v2977_v3  ;;  %v543_v24 = vld [vmem:[%s3480_s6] sm:$0xff] (!%p324_p9)  ;;  %v546_v28 = vld [vmem:[%s3480_s6 + $0x18] sm:$0xff] (!%p324_p9)  ;;  %v2424_v43 = vld [vmem:[%s3476_s2 + $0x28] sm:$0xff] (!%p324_p9)  ;;  %s3431_s27 = scalar_lea.hbm (!%p324_p9), %s3484_s10, %s2504_s18 }
  0x12   : > { %2786 = vmatprep.subr.bf16.mxu0 (!%p324_p9), %v2977_v3  ;;  %v2796_v27 = vpack.c.bf16 (!%p324_p9), %v544_v25, %v543_v24  ;;  %v2799_v29 = vpack.c.bf16 (!%p324_p9), %v546_v28, %v545_v26  ;;  %v2418_v39 = vld [vmem:[%s3481_s7] ss:$0 sm:$0xff] (!%p324_p9)  ;;  %v2425_v45 = vld [vmem:[%s3476_s2 + $0x30] sm:$0xff] (!%p324_p9)  ;;  %v2426_v46 = vld [vmem:[%s3476_s2 + $0x38] sm:$0xff] (!%p324_p9) }
  0x13   : > { %v2423_v42 = vld [vmem:[%s3476_s2 + $0x20] sm:$0xff] (!%p324_p9)  ;;  %v2805_v47 = vpack.c.bf16 (!%p324_p9), %v2426_v46, %v2425_v45  ;;  %v2431_v50 = vld [vmem:[%s3478_s4 + $0x28] sm:$0xff] (!%p324_p9)  ;;  %v2432_v54 = vld [vmem:[%s3478_s4 + $0x30] sm:$0xff] (!%p324_p9) }
  0x14   : > { %2794 = vmatpush3.bf16.msra.mxu1 (!%p324_p9), %v2793_v12  ;;  %v2802_v44 = vpack.c.bf16 (!%p324_p9), %v2424_v43, %v2423_v42  ;;  %v2430_v49 = vld [vmem:[%s3478_s4 + $0x20] sm:$0xff] (!%p324_p9)  ;;  %v2433_v55 = vld [vmem:[%s3478_s4 + $0x38] sm:$0xff] (!%p324_p9)  ;;  %v2438_v5 = vld [vmem:[%s3480_s6 + $0x28] sm:$0xff] (!%p324_p9) }
  0x15   : > { %s365_s30 = scalar_select %p364_p10, %s3057_s17, 1  ;;  %2788 = vmatpush3.bf16.msra.mxu0 %v2787_v13  ;;  %2624 = vmatprep.subr.mxu1 %v2979_v11  ;;  %v2808_v52 = vpack.c.bf16 %v2431_v50, %v2430_v49  ;;  %v2811_v56 = vpack.c.bf16 %v2433_v55, %v2432_v54  ;;  %v2435_v61 = vld [vmem:[%s3479_s5 + $0x1] ss:$0 sm:$0xff]  ;;  %v2439_v6 = vld [vmem:[%s3480_s6 + $0x30] sm:$0xff]  ;;  %v2440_v8 = vld [vmem:[%s3480_s6 + $0x38] sm:$0xff] }
  0x16   : > { %2795 = vmatprep.subr.bf16.mxu0 %v2977_v3  ;;  %v2428_v62 = vld [vmem:[%s3477_s3 + $0x1] ss:$0 sm:$0xff]  ;;  %v2817_v9 = vpack.c.bf16 %v2440_v8, %v2439_v6  ;;  %v2447_v25 = vld [vmem:[%s3482_s8 + $0x8] sm:$0xff]  ;;  %v2462_v46 = vld [vmem:[%s3479_s5 + $0x2] ss:$0 sm:$0xff]  ;;  %s2980_s17 = smov [#allocation2]  }
  0x17   : > { %s2412_s11 = sshll.u32 %s365_s30, 3  ;;  %v2437_v4 = vld [vmem:[%s3480_s6 + $0x20] sm:$0xff]  ;;  %s2411_s30 = sshll.u32 %s361_s29, 3 }
  0x18   : > { %s367_s20 = scalar_lea.vmem %s3474_s0, %s2412_s11  ;;  %s371_s26 = scalar_lea.vmem %s3475_s1, %s2412_s11  ;;  %v2814_v7 = vpack.c.bf16 %v2438_v5, %v2437_v4 }
  0x19   : > { %v3124_v14 = vld [vmem:[%s367_s20] sm:$0xff]  ;;  %s363_s20 = scalar_lea.vmem [#allocation2], %s2411_s30  ;;  %s2917_s30 = sshll.u32 %s2980_s17, 4  ;;  %s2918_s30 = int_to_ptr.vmem [resolvable:$false] %s2917_s30 }
  0x1a   : > { %v3126_v15 = vld [vmem:[%s371_s26] sm:$0xff]  ;;  %2611 = vmatmul.mubr.msk.f32.vlgmr.msra.gmra.mrb[0].mxu1 %vm385_vm1, %v3124_v14  ;;  %s2336_s21 = sshll.u32 %s363_s20, 4  ;;  %s2919_s12 = scalar_lea.vmem %s2918_s30, 256  ;;  %s3433_s21 = int_to_ptr.vmem [resolvable:$true] %s2336_s21 }
  0x1b   : > { %2600 = vmatmul.mubr.msk.f32.vlgmr.msra.gmra.mrb[0].mxu0 %vm385_vm1, %v3126_v15  ;;  %2626 = vmatprep.mubr.msk.f32.mxu1 %vm2978_vm0, %v2979_v11  ;;  %s2913_s11 = scalar_lea.vmem %s3433_s21, 128  ;;  %p2920_p0 = scmp.lt.s32.totalorder %s3433_s21, %s2918_s30 }
  0x1c   : > { %2621 = vmatprep.mubr.msk.f32.mxu0 %vm2978_vm0, %v2979_v11  ;;  %2797 = vmatpush3.bf16.msra.mxu0 %v2796_v27  ;;  %p2914_p11 = scmp.ne.s32.totalorder %s3433_s21, %s2913_s11  ;;  %p2921_p1 = scmp.lt.s32.totalorder %s2919_s12, %s2913_s11 }
  0x1d   : > { %2798 = vmatprep.subr.bf16.mxu0 %v2977_v3 }
  0x1e   : > { %p2915_p12 = pnand %p2914_p11, %p3074_p5  ;;  %p2922_p2 = por %p2921_p1, %p2920_p0 }
  0x20   : > { %2800 = vmatpush3.bf16.msra.mxu0 %v2799_v29  ;;  %v785_v29 = vld [vmem:[%s3482_s8] sm:$0xff]  ;;  %p2916_p13 = pneg %p2915_p12 }
  0x21   : > { %2801 = vmatprep.subr.bf16.mxu0 %v2977_v3 }
  0x22   : > { %p2923_p3 = pnand %p2922_p2, %p2916_p13 }
  0x23   : > { %2622 = vmatmul.mubr.msk.f32.vlgmr.msra.gmra.mrb[2].mxu0 %vm385_vm1, %v3124_v14 }
  0x24   : > { %2642 = vmatprep.mubr.msk.f32.mxu0 %vm2978_vm0, %v2979_v11  ;;  %2803 = vmatpush3.bf16.msra.mxu0 %v2802_v44 }
  0x25   : > { %2804 = vmatprep.subr.bf16.mxu0 %v2977_v3 }
  0x28   : > { %2806 = vmatpush3.bf16.msra.mxu0 %v2805_v47 }
  0x29   : > { %2813 = vmatprep.subr.bf16.mxu0 %v2977_v3 }
  0x2b   : > { %2643 = vmatmul.mubr.msk.f32.vlgmr.msra.gmra.mrb[4].mxu0 %vm385_vm1, %v3126_v15 }
  0x2c   : > { %2664 = vmatprep.mubr.msk.f32.mxu0 %vm2978_vm0, %v2979_v11  ;;  %2815 = vmatpush3.bf16.msra.mxu0 %v2814_v7 }
  0x2d   : > { %2816 = vmatprep.subr.bf16.mxu0 %v2977_v3 }
  0x30   : > { %2818 = vmatpush3.bf16.msra.mxu0 %v2817_v9  ;;  %v2469_v9 = vld [vmem:[%s3481_s7 + $0x2] ss:$0 sm:$0xff] }
  0x31   : > { %2677 = vmatprep.subr.mxu0 %v2979_v11 }
  0x33   : > { %2665 = vmatmul.mubr.msk.f32.vlgmr.msra.gmra.mrb[6].mxu0 %vm385_vm1, %v3124_v14 }
  0x34   : > { %2679 = vmatprep.mubr.msk.f32.mxu0 %vm2978_vm0, %v2979_v11  ;;  %2678 = vmatpush3.msra.mxu0 %v2447_v25  ;;  %v2483_v25 = vld [vmem:[%s3478_s4 + $0x60] sm:$0xff] }
  0x35   : > { %2819 = vmatprep.subr.bf16.mxu0 %v2977_v3 }
  0xed   : > { %v539_v18 = vpop.f32.mrb[0].mxu1 }
  0xee   : > { %v540_v19 = vadd.f32 %v2416_v16, %v539_v18  ;;  %v2612_v20 = vpop.f32.mrb[1].mxu1  ;;  %v455_v21 = vpop.f32.mrb[0].mxu0 }
  0xef   : > { %v456_v22 = vadd.f32 %v2414_v17, %v455_v21  ;;  %v2601_v23 = vpop.f32.mrb[1].mxu0 }
  0xf0   : > { %2625 = vmatpush3.xpose.msk.msra.mxu1 %vm624_vm2, %v540_v19 }
  0xf1   : > { %2629 = vmatprep.subr.mxu1 %v2979_v11 }
  0xf3   : > { %2627 = vmatmul.mubr.msk.f32.vlgmr.msra.gmra.mrb[2].mxu1 %vm624_vm2, %v456_v22  ;;  %v2442_v22 = vld [vmem:[%s3481_s7 + $0x1] ss:$0 sm:$0xff] }
  0xf4   : > { %2631 = vmatprep.mubr.msk.f32.mxu1 %vm2978_vm0, %v2979_v11 }
  0xf6   : > { %v620_v38 = vpop.f32.mrb[2].mxu0 }
  0xf7   : > { %v2623_v40 = vpop.f32.mrb[3].mxu0  ;;  %v621_v41 = vadd.f32 %v2418_v39, %v620_v38  ;;  %v2452_v39 = vld [vmem:[%s3476_s2 + $0x50] sm:$0xff] }
  0xf8   : > { %v2453_v40 = vld [vmem:[%s3476_s2 + $0x58] sm:$0xff] }
  0xf9   : > { %2630 = vmatpush3.msra.mxu1 %v621_v41  ;;  %v2823_v43 = vpack.c.bf16 %v2453_v40, %v2452_v39 }
  0xfa   : > { %2807 = vmatprep.subr.bf16.mxu1 %v2977_v3 }
  0xfe   : > { %v865_v57 = vpop.f32.mrb[4].mxu0 }
  0xff   : > { %v2644_v58 = vpop.f32.mrb[5].mxu0  ;;  %v866_v2 = vadd.f32 %v2428_v62, %v865_v57  ;;  %v2464_v57 = vld [vmem:[%s3480_s6 + $0x40] sm:$0xff] }
 0x100   : > { %v2465_v58 = vld [vmem:[%s3480_s6 + $0x48] sm:$0xff] }
 0x106   : > { %v1031_v21 = vpop.f32.mrb[6].mxu0 }
 0x107   : > { %v2666_v23 = vpop.f32.mrb[7].mxu0  ;;  %v1032_v24 = vadd.f32 %v2442_v22, %v1031_v21  ;;  %v2478_v22 = vld [vmem:[%s3476_s2 + $0x70] sm:$0xff] }
 0x108   : > { %v2479_v23 = vld [vmem:[%s3476_s2 + $0x78] sm:$0xff] }
 0x1c6   : > { %v697_v30 = vpop.f32.mrb[2].mxu1 }
 0x1c7   : > { %v2628_v31 = vpop.f32.mrb[3].mxu1  ;;  %v701_v32 = vsel %vm624_vm2, %v697_v30, -inf }
 0x1c8   : > { %702 = vmax.xlane.f32.xlu0 %v701_v32  ;;  %v2458_v31 = vld [vmem:[%s3478_s4 + $0x48] sm:$0xff] }
 0x255   : > { %v703_v33 = vpop.xlane.xlu0 %702 }
 0x256   : > { %v704_v34 = vsub.f32 %v697_v30, %v703_v33  ;;  %v2457_v30 = vld [vmem:[%s3478_s4 + $0x40] sm:$0xff]  ;;  %v2459_v33 = vld [vmem:[%s3478_s4 + $0x50] sm:$0xff] }
 0x257   : > { %v2826_v32 = vpack.c.bf16 %v2458_v31, %v2457_v30 }
 0x258   : > { %v705_v35 = vmul.f32 1.442695, %v704_v34  ;;  %v2460_v34 = vld [vmem:[%s3478_s4 + $0x58] sm:$0xff] }
 0x25a   : > { %2897 = vpow2.f32 %v705_v35  ;;  %v2829_v35 = vpack.c.bf16 %v2460_v34, %v2459_v33 }
 0x264   : > { %v2898_v36 = vpop.eup %2897 }
 0x265   : > { %v707_v37 = vsel %vm624_vm2, %v2898_v36, 0.0 }
 0x266   : > { %708 = vadd.xlane.f32.xlu0 %v707_v37  ;;  %v2451_v37 = vld [vmem:[%s3476_s2 + $0x48] sm:$0xff] }
 0x2f3   : > { %v709_v48 = vpop.xlane.xlu0 %708 }
 0x2f4   : > { %2899 = vrcp.f32 %v709_v48 }
 0x2fe   : > { %v2900_v51 = vpop.eup %2899 }
 0x2ff   : > { %v711_v53 = vmul.f32 %v2900_v51, %v2898_v36  ;;  %v2450_v36 = vld [vmem:[%s3476_s2 + $0x40] sm:$0xff] }
 0x300   : > { %v2820_v38 = vpack.c.bf16 %v2451_v37, %v2450_v36  ;;  %v2488_v37 = vld [vmem:[%s3479_s5 + $0x3] ss:$0 sm:$0xff] }
 0x301   : > { %2632 = vmatmul.mubr.msk.f32.vlgmr.msra.gmra.mrb[4].mxu1 %vm624_vm2, %v711_v53  ;;  %v2455_v53 = vld [vmem:[%s3477_s3 + $0x2] ss:$0 sm:$0xff] }
 0x302   : > { %2809 = vmatpush3.bf16.msra.mxu1 %v2808_v52  ;;  %2653 = vmatprep.mubr.msk.f32.mxu1 %vm2978_vm0, %v2979_v11 }
 0x303   : > { %2810 = vmatprep.subr.bf16.mxu1 %v2977_v3 }
 0x306   : > { %2812 = vmatpush3.bf16.msra.mxu1 %v2811_v56 }
 0x307   : > { %2667 = vmatprep.subr.mxu1 %v2979_v11 }
 0x309   : > { %2654 = vmatmul.mubr.msk.f32.vlgmr.msra.gmra.mrb[6].mxu1 %vm385_vm1, %v3124_v14 }
 0x30a   : > { %2669 = vmatprep.mubr.msk.f32.mxu1 %vm2978_vm0, %v2979_v11 }
 0x3d4   : > { %v781_v59 = vpop.f32.mrb[4].mxu1 }
 0x3d5   : > { %v2633_v60 = vpop.f32.mrb[5].mxu1 }
 0x3d6   : > { %v2832_v60 = vpack.c.bf16 %v2465_v58, %v2464_v57  ;;  %v2500_v58 = vld [vmem:[%s3482_s8 + $0x18] sm:$0xff] }
 0x3dc   : > { %v948_v63 = vpop.f32.mrb[6].mxu1 }
 0x3dd   : > { %v949_v0 = vadd.f32 %v2435_v61, %v948_v63  ;;  %v2655_v1 = vpop.f32.mrb[7].mxu1  ;;  %v2467_v61 = vld [vmem:[%s3480_s6 + $0x58] sm:$0xff] }
 0x3df   : > { %2668 = vmatpush3.xpose.msk.msra.mxu1 %vm624_vm2, %v949_v0 }
 0x3e0   : > { %2672 = vmatprep.subr.mxu1 %v2979_v11 }
 0x3e2   : > { %2670 = vmatmul.mubr.msk.f32.vlgmr.msra.gmra.mrb[8].mxu1 %vm624_vm2, %v866_v2 }
 0x3e3   : > { %2674 = vmatprep.mubr.msk.f32.mxu1 %vm2978_vm0, %v2979_v11  ;;  %2673 = vmatpush3.msra.mxu1 %v1032_v24  ;;  %v2841_v24 = vpack.c.bf16 %v2479_v23, %v2478_v22 }
 0x3e4   : > { %2682 = vmatprep.subr.mxu1 %v2979_v11 }
 0x4b5   : > { %v1107_v10 = vpop.f32.mrb[8].mxu1 }
 0x4b6   : > { %v2671_v12 = vpop.f32.mrb[9].mxu1  ;;  %v1111_v13 = vsel %vm624_vm2, %v1107_v10, -inf }
 0x4b7   : > { %1112 = vmax.xlane.f32.xlu1 %v1111_v13  ;;  %v2474_v13 = vld [vmem:[%s3482_s8 + $0x10] sm:$0xff] }
 0x544   : > { %v1113_v16 = vpop.xlane.xlu1 %1112 }
 0x545   : > { %v1114_v17 = vsub.f32 %v1107_v10, %v1113_v16 }
 0x547   : > { %v1115_v18 = vmul.f32 1.442695, %v1114_v17 }
 0x549   : > { %2901 = vpow2.f32 %v1115_v18 }
 0x553   : > { %v2902_v19 = vpop.eup %2901 }
 0x554   : > { %v1117_v20 = vsel %vm624_vm2, %v2902_v19, 0.0 }
 0x555   : > { %1118 = vadd.xlane.f32.xlu1 %v1117_v20  ;;  %v2477_v20 = vld [vmem:[%s3476_s2 + $0x68] sm:$0xff] }
 0x5e2   : > { %v1119_v26 = vpop.xlane.xlu1 %1118 }
 0x5e3   : > { %2903 = vrcp.f32 %v1119_v26  ;;  %v2484_v26 = vld [vmem:[%s3478_s4 + $0x68] sm:$0xff] }
 0x5ed   : > { %v2904_v27 = vpop.eup %2903 }
 0x5ee   : > { %v1121_v28 = vmul.f32 %v2904_v27, %v2902_v19  ;;  %v2476_v19 = vld [vmem:[%s3476_s2 + $0x60] sm:$0xff]  ;;  %v2844_v27 = vpack.c.bf16 %v2484_v26, %v2483_v25 }
 0x5ef   : > { %v2838_v21 = vpack.c.bf16 %v2477_v20, %v2476_v19 }
 0x5f0   : > { %2675 = vmatmul.mubr.msk.f32.vlgmr.msra.gmra.mrb[10].mxu1 %vm624_vm2, %v1121_v28  ;;  %v2485_v28 = vld [vmem:[%s3478_s4 + $0x70] sm:$0xff] }
 0x5f1   : > { %2683 = vmatpush3.msra.mxu1 %v785_v29  ;;  %2684 = vmatprep.mubr.msk.f32.mxu1 %vm2978_vm0, %v2979_v11 }
 0x5f2   : > { %2825 = vmatprep.subr.bf16.mxu1 %v2977_v3 }
 0x5f4   : > { %2685 = vmatmul.mubr.msk.f32.vlgmr.msra.gmra.mrb[12].mxu1 %vm624_vm2, %v781_v59  ;;  %v2466_v59 = vld [vmem:[%s3480_s6 + $0x50] sm:$0xff] }
 0x5f5   : > { %2827 = vmatpush3.bf16.msra.mxu1 %v2826_v32  ;;  %2706 = vmatprep.mubr.msk.f32.mxu1 %vm2978_vm0, %v2979_v11  ;;  %v2835_v62 = vpack.c.bf16 %v2467_v61, %v2466_v59 }
 0x5f6   : > { %2828 = vmatprep.subr.bf16.mxu1 %v2977_v3 }
 0x5f9   : > { %2830 = vmatpush3.bf16.msra.mxu1 %v2829_v35 }
 0x5fa   : > { %2720 = vmatprep.subr.mxu1 %v2979_v11 }
 0x5fc   : > { %2707 = vmatmul.mubr.msk.f32.vlgmr.msra.gmra.mrb[14].mxu1 %vm385_vm1, %v3124_v14 }
 0x5fd   : > { %2722 = vmatprep.mubr.msk.f32.mxu1 %vm2978_vm0, %v2979_v11 }
 0x6c3   : > { %v1191_v41 = vpop.f32.mrb[10].mxu1 }
 0x6c4   : > { %v2676_v42 = vpop.f32.mrb[11].mxu1  ;;  %2680 = vmatmul.mubr.msk.f32.vlgmr.msra.gmra.mrb[8].mxu0 %vm624_vm2, %v1191_v41 }
 0x6c5   : > { %2821 = vmatpush3.bf16.msra.mxu0 %v2820_v38  ;;  %2695 = vmatprep.mubr.msk.f32.mxu0 %vm2978_vm0, %v2979_v11  ;;  %v2481_v38 = vld [vmem:[%s3477_s3 + $0x3] ss:$0 sm:$0xff] }
 0x6c6   : > { %2822 = vmatprep.subr.bf16.mxu0 %v2977_v3 }
 0x6c7   : > { %v1339_v44 = vpop.f32.mrb[12].mxu1 }
 0x6c8   : > { %v2686_v45 = vpop.f32.mrb[13].mxu1 }
 0x6c9   : > { %2824 = vmatpush3.bf16.msra.mxu0 %v2823_v43  ;;  %v2490_v43 = vld [vmem:[%s3480_s6 + $0x60] sm:$0xff]  ;;  %v2492_v45 = vld [vmem:[%s3480_s6 + $0x70] sm:$0xff] }
 0x6ca   : > { %2831 = vmatprep.subr.bf16.mxu0 %v2977_v3 }
 0x6cc   : > { %2696 = vmatmul.mubr.msk.f32.vlgmr.msra.gmra.mrb[10].mxu0 %vm385_vm1, %v3126_v15 }
 0x6cd   : > { %2717 = vmatprep.mubr.msk.f32.mxu0 %vm2978_vm0, %v2979_v11  ;;  %2833 = vmatpush3.bf16.msra.mxu0 %v2832_v60 }
 0x6ce   : > { %2834 = vmatprep.subr.bf16.mxu0 %v2977_v3 }
 0x6cf   : > { %v1505_v47 = vpop.f32.mrb[14].mxu1 }
 0x6d0   : > { %v1506_v48 = vadd.f32 %v2462_v46, %v1505_v47  ;;  %v2708_v49 = vpop.f32.mrb[15].mxu1  ;;  %v2493_v47 = vld [vmem:[%s3480_s6 + $0x78] sm:$0xff] }
 0x6d1   : > { %2836 = vmatpush3.bf16.msra.mxu0 %v2835_v62 }
 0x6d2   : > { %2721 = vmatpush3.xpose.msk.msra.mxu1 %vm624_vm2, %v1506_v48  ;;  %2730 = vmatprep.subr.mxu0 %v2979_v11  ;;  %v2853_v48 = vpack.c.bf16 %v2493_v47, %v2492_v45 }
 0x6d3   : > { %2725 = vmatprep.subr.mxu1 %v2979_v11 }
 0x6d4   : > { %2718 = vmatmul.mubr.msk.f32.vlgmr.msra.gmra.mrb[12].mxu0 %vm385_vm1, %v3124_v14 }
 0x6d5   : > { %2732 = vmatprep.mubr.msk.f32.mxu0 %vm2978_vm0, %v2979_v11  ;;  %2731 = vmatpush3.msra.mxu0 %v2474_v13 }
 0x6d6   : > { %2843 = vmatprep.subr.bf16.mxu0 %v2977_v3 }
 0x797   : > { %v1266_v50 = vpop.f32.mrb[8].mxu0 }
 0x798   : > { %v3305_v51 = vadd.f32 %v1339_v44, %v1266_v50  ;;  %v2681_v52 = vpop.f32.mrb[9].mxu0  ;;  %v2491_v44 = vld [vmem:[%s3480_s6 + $0x68] sm:$0xff] }
 0x799   : > { %v2850_v46 = vpack.c.bf16 %v2491_v44, %v2490_v43 }
 0x79f   : > { %v1422_v54 = vpop.f32.mrb[10].mxu0 }
 0x7a0   : > { %v1423_v55 = vadd.f32 %v2455_v53, %v1422_v54  ;;  %v2697_v56 = vpop.f32.mrb[11].mxu0 }
 0x7a2   : > { %2723 = vmatmul.mubr.msk.f32.vlgmr.msra.gmra.mrb[16].mxu1 %vm624_vm2, %v1423_v55 }
 0x7a3   : > { %2727 = vmatprep.mubr.msk.f32.mxu1 %vm2978_vm0, %v2979_v11 }
 0x7a7   : > { %v1588_v8 = vpop.f32.mrb[12].mxu0 }
 0x7a8   : > { %v2719_v10 = vpop.f32.mrb[13].mxu0  ;;  %v1589_v12 = vadd.f32 %v2469_v9, %v1588_v8 }
 0x7aa   : > { %2726 = vmatpush3.msra.mxu1 %v1589_v12 }
 0x7ab   : > { %2837 = vmatprep.subr.bf16.mxu1 %v2977_v3 }
 0x875   : > { %v1664_v63 = vpop.f32.mrb[16].mxu1 }
 0x876   : > { %v2724_v0 = vpop.f32.mrb[17].mxu1  ;;  %v1668_v1 = vsel %vm624_vm2, %v1664_v63, -inf }
 0x877   : > { %1669 = vmax.xlane.f32.xlu0 %v1668_v1  ;;  %v2502_v1 = vld [vmem:[%s3483_s9] ss:$0 sm:$0xff] }
 0x904   : > { %v1670_v2 = vpop.xlane.xlu0 %1669 }
 0x905   : > { %v1671_v4 = vsub.f32 %v1664_v63, %v1670_v2 }
 0x907   : > { %v1672_v5 = vmul.f32 1.442695, %v1671_v4 }
 0x909   : > { %2905 = vpow2.f32 %v1672_v5 }
 0x913   : > { %v2906_v6 = vpop.eup %2905 }
 0x914   : > { %v1674_v7 = vsel %vm624_vm2, %v2906_v6, 0.0 }
 0x915   : > { %1675 = vadd.xlane.f32.xlu1 %v1674_v7 }
 0x9a2   : > { %v1676_v16 = vpop.xlane.xlu1 %1675 }
 0x9a3   : > { %2907 = vrcp.f32 %v1676_v16 }
 0x9ad   : > { %v2908_v17 = vpop.eup %2907 }
 0x9ae   : > { %v1678_v18 = vmul.f32 %v2908_v17, %v2906_v6 }
 0x9b0   : > { %2728 = vmatmul.mubr.msk.f32.vlgmr.msra.gmra.mrb[18].mxu1 %vm624_vm2, %v1678_v18 }
 0x9b1   : > { %2743 = vmatprep.mubr.msk.f32.mxu1 %vm2978_vm0, %v2979_v11  ;;  %2839 = vmatpush3.bf16.msra.mxu1 %v2838_v21 }
 0x9b2   : > { %2840 = vmatprep.subr.bf16.mxu1 %v2977_v3 }
 0x9b5   : > { %2842 = vmatpush3.bf16.msra.mxu1 %v2841_v24 }
 0x9b6   : > { %2849 = vmatprep.subr.bf16.mxu1 %v2977_v3 }
 0x9b8   : > { %2744 = vmatmul.mubr.msk.f32.vlgmr.msra.gmra.mrb[20].mxu1 %vm385_vm1, %v3126_v15  ;;  %v2486_v15 = vld [vmem:[%s3478_s4 + $0x78] sm:$0xff] }
 0x9b9   : > { %2765 = vmatprep.mubr.msk.f32.mxu1 %vm2978_vm0, %v2979_v11  ;;  %v2847_v31 = vpack.c.bf16 %v2486_v15, %v2485_v28  ;;  %2851 = vmatpush3.bf16.msra.mxu1 %v2850_v46 }
 0x9ba   : > { %2852 = vmatprep.subr.bf16.mxu1 %v2977_v3 }
 0x9bd   : > { %2854 = vmatpush3.bf16.msra.mxu1 %v2853_v48 }
 0x9be   : > { %2778 = vmatprep.subr.mxu1 %v2979_v11 }
 0x9c0   : > { %2766 = vmatmul.mubr.msk.f32.vlgmr.msra.gmra.mrb[22].mxu1 %vm385_vm1, %v3124_v14 }
 0x9c1   : > { %2780 = vmatprep.mubr.msk.f32.mxu1 %vm2978_vm0, %v2979_v11  ;;  %2779 = vmatpush3.msra.mxu1 %v2500_v58 }
 0xa83   : > { %v1748_v29 = vpop.f32.mrb[18].mxu1 }
 0xa84   : > { %v2729_v30 = vpop.f32.mrb[19].mxu1  ;;  %2733 = vmatmul.mubr.msk.f32.vlgmr.msra.gmra.mrb[14].mxu0 %vm624_vm2, %v1748_v29 }
 0xa85   : > { %2845 = vmatpush3.bf16.msra.mxu0 %v2844_v27  ;;  %2754 = vmatprep.mubr.msk.f32.mxu0 %vm2978_vm0, %v2979_v11 }
 0xa86   : > { %2846 = vmatprep.subr.bf16.mxu0 %v2977_v3 }
 0xa89   : > { %2848 = vmatpush3.bf16.msra.mxu0 %v2847_v31 }
 0xa8a   : > { %2768 = vmatprep.subr.mxu0 %v2979_v11 }
 0xa8b   : > { %v1907_v32 = vpop.f32.mrb[20].mxu1 }
 0xa8c   : > { %2755 = vmatmul.mubr.msk.f32.vlgmr.msra.gmra.mrb[16].mxu0 %vm385_vm1, %v3124_v14  ;;  %v2745_v33 = vpop.f32.mrb[21].mxu1  ;;  %v1908_v42 = vadd.f32 %v2481_v38, %v1907_v32  ;;  %v2495_v14 = vld [vmem:[%s3481_s7 + $0x3] ss:$0 sm:$0xff] }
 0xa8d   : > { %2770 = vmatprep.mubr.msk.f32.mxu0 %vm2978_vm0, %v2979_v11 }
 0xa93   : > { %v2073_v56 = vpop.f32.mrb[22].mxu1 }
 0xa94   : > { %v2074_v57 = vadd.f32 %v2495_v14, %v2073_v56 }
 0xb57   : > { %v1823_v34 = vpop.f32.mrb[14].mxu0 }
 0xb58   : > { %v1827_v35 = vadd.f32 %v1823_v34, %v3305_v51  ;;  %v2734_v36 = vpop.f32.mrb[15].mxu0 }
 0xb5f   : > { %v1990_v39 = vpop.f32.mrb[16].mxu0 }
 0xb60   : > { %v1991_v40 = vadd.f32 %v2488_v37, %v1990_v39  ;;  %v2756_v41 = vpop.f32.mrb[17].mxu0 }
 0xb62   : > { %2769 = vmatpush3.xpose.msk.msra.mxu0 %vm624_vm2, %v1991_v40 }
 0xb63   : > { %2773 = vmatprep.subr.mxu0 %v2979_v11 }
 0xb65   : > { %2771 = vmatmul.mubr.msk.f32.vlgmr.msra.gmra.mrb[18].mxu0 %vm624_vm2, %v1908_v42 }
 0xb66   : > { %2775 = vmatprep.mubr.msk.f32.mxu0 %vm2978_vm0, %v2979_v11  ;;  %v2767_v11 = vpop.f32.mrb[23].mxu1  ;;  %2774 = vmatpush3.msra.mxu0 %v2074_v57 }
 0xc38   : > { %v2149_v49 = vpop.f32.mrb[18].mxu0 }
 0xc39   : > { %v2772_v50 = vpop.f32.mrb[19].mxu0  ;;  %v2153_v51 = vsel %vm624_vm2, %v2149_v49, -inf }
 0xc3a   : > { %2154 = vmax.xlane.f32.xlu0 %v2153_v51 }
 0xcc7   : > { %v2155_v52 = vpop.xlane.xlu0 %2154 }
 0xcc8   : > { %v2156_v53 = vsub.f32 %v2149_v49, %v2155_v52 }
 0xcca   : > { %v2157_v54 = vmul.f32 1.442695, %v2156_v53 }
 0xccc   : > { %2909 = vpow2.f32 %v2157_v54 }
 0xcd6   : > { %v2910_v55 = vpop.eup %2909 }
 0xcd7   : > { %v2159_v3 = vsel %vm624_vm2, %v2910_v55, 0.0 }
 0xcd8   : > { %2160 = vadd.xlane.f32.xlu1 %v2159_v3 }
 0xd65   : > { %v2161_v59 = vpop.xlane.xlu1 %2160 }
 0xd66   : > { %2911 = vrcp.f32 %v2161_v59 }
 0xd70   : > { %v2912_v60 = vpop.eup %2911 }
 0xd71   : > { %v2163_v61 = vmul.f32 %v2912_v60, %v2910_v55 }
 0xd73   : > { %2776 = vmatmul.mubr.msk.f32.vlgmr.msra.gmra.mrb[20].mxu0 %vm624_vm2, %v2163_v61 }
 0xe46   : > { %v2233_v62 = vpop.f32.mrb[20].mxu0 }
 0xe47   : > { %v2777_v63 = vpop.f32.mrb[21].mxu0  ;;  %2781 = vmatmul.mubr.msk.f32.vlgmr.msra.gmra.mrb[24].mxu1 %vm624_vm2, %v2233_v62 }
 0xf1a   : > { %v2308_v0 = vpop.f32.mrb[24].mxu1 }
 0xf1b   : > { %v2312_v2 = vadd.f32 %v2308_v0, %v1827_v35  ;;  %v2782_v4 = vpop.f32.mrb[25].mxu1 }
 0xf1d   : > { %v2320_v5 = vadd.f32 %v2502_v1, %v2312_v2 }
 0xf1f   : > { %2321 = vst.msk [vmem:[%s363_s20] sm:$0xff] %vm385_vm1, %v2320_v5 }
 0xf20   : > { %2926 = shalt.err (!%p2923_p3)
}
 0xf21   : > { %s2927_s29 = scalar_lea.hbm %s3431_s27, 128  ;;  %s2931_s25 = scalar_lea.hbm %s3484_s10, 256 }
 0xf22   : > { %p2928_p4 = scmp.ne.s32.totalorder %s3431_s27, %s2927_s29  ;;  %p2932_p9 = scmp.lt.u32.totalorder %s3431_s27, %s3484_s10 }
 0xf23   : > { %p2933_p10 = scmp.lt.u32.totalorder %s2931_s25, %s2927_s29  ;;  %p2935_p12 = scmp.lt.u32.totalorder %s2927_s29, %s3431_s27 }
 0xf24   : > { %p2929_p7 = pnand %p2928_p4, %p3074_p5 }
 0xf25   : > { %p2934_p11 = por %p2933_p10, %p2932_p9 }
 0xf26   : > { %p2930_p8 = pneg %p2929_p7 }
 0xf27   : > { %p2936_p13 = por %p2935_p12, %p2934_p11 }
 0xf29   : > { %p2937_p0 = pnand %p2936_p13, %p2930_p8 }
 0xf2b   : > { %2940 = shalt.err (!%p2937_p0)
}
 0xf2c   : > { %2855 = dma.vmem_to_hbm [thread:$0]  (%p3074_p5), %s3433_s21, 128, %s3431_s27, %s2323_s28  }
 0xf2d PF: > { %p2861_p1 = scmp.ge.s32.totalorder %s2975_s16, 2  ;;  %s2348_s11 = sand.u32 1, %s2963_s13  }
 0xf2e   : > { %s2349_s30 = scalar_lea.sflag [#allocation3], %s2348_s11 }
 0xf2f   : > { %p2858_p2 = pnand %p2861_p1, %p3078_p6 }
 0xf31   : > { %2958 = dma.done.wait (!%p2858_p2), %s2349_s30, 128  }
 0xf32   : > { %2960 = vsyncadd (!%p2858_p2), %s2349_s30, 4294967168  ;;  %p20_p3 = scmp.ge.s32.totalorder %s3061_s19, 4   ;;  %s3487_s13 = smov %s2967_s14 }
 0xf33   : > { %s3488_s14 = smov %s2971_s15  ;;  %s3489_s15 = smov %s3072_s22 }
 0xf34   : > { %s3490_s16 = smov %s3061_s19  ;;  %22 = sbr.rel (!%p20_p3) target bundleno = 3 (0x3), region = 119 }
 0xf3b   :  { %2354 = vsyncpa [#allocation3], 1 }
 0xf3c   :  { %2356 = vsyncpa [#allocation3 + $0x1], 1 }

// kernel: tpu_custom_call.1
= control target key start
LH: loop header
LB: loop body
LE: loop exit
PB: predicated region body
PF: predicated region fallthrough
CT: control target
= control target key end

     0   :  { %15 = vsyncpa [#allocation3], 0  ;;  %s3474_s0 = inlined_call_operand.vmem [shape: f32[2,8,32], index: 0, kind: input, shape index: {}]   ;;  %s3475_s1 = inlined_call_operand.vmem [shape: f32[2,8,32], index: 1, kind: input, shape index: {}]   ;;  %s3476_s2 = inlined_call_operand.vmem [shape: f32[4,32,8], index: 2, kind: input, shape index: {}]   ;;  %s3477_s3 = inlined_call_operand.vmem [shape: f32[4,1,8], index: 3, kind: input, shape index: {}]   ;;  %s3478_s4 = inlined_call_operand.vmem [shape: f32[4,32,8], index: 4, kind: input, shape index: {}]   ;;  %s3479_s5 = inlined_call_operand.vmem [shape: f32[4,1,8], index: 5, kind: input, shape index: {}]   ;;  %s3480_s6 = inlined_call_operand.vmem [shape: f32[4,32,8], index: 6, kind: input, shape index: {}]   ;;  %s3481_s7 = inlined_call_operand.vmem [shape: f32[4,1,8], index: 7, kind: input, shape index: {}]   ;;  %s3482_s8 = inlined_call_operand.vmem [shape: f32[4,8,32], index: 8, kind: input, shape index: {}]   ;;  %s3483_s9 = inlined_call_operand.vmem [shape: f32[1,32], index: 9, kind: input, shape index: {}]   ;;  %s3484_s10 = inlined_call_operand.hbm [shape: f32[2,8,32], index: 10, kind: output, shape index: {}]  }
   0x1   :  { %17 = vsyncpa [#allocation3 + $0x1], 0  ;;  %s3036_s13 = smov 0   ;;  %s3038_s14 = smov 0  }
   0x2   :  { %s3040_s15 = smov 0   ;;  %s3042_s16 = smov 0  }
   0x3 LB: > { %s3057_s17 = sadd.s32 4294967295, %s2975_s16   ;;  %s2407_s18 = sadd.s32 4294967294, %s2975_s16   ;;  %s2975_s16 = sphi %s3042_s16, %s3490_s16   ;;  %s2971_s15 = sphi %s3040_s15, %s3489_s15   ;;  %s2967_s14 = sphi %s3038_s14, %s3488_s14   ;;  %s2963_s13 = sphi %s3036_s13, %s3487_s13  }
   0x4   : > { %s3061_s19 = sadd.s32 1, %s2975_s16   ;;  %s250_s20 = sadd.s32 1, %s2971_s15 }
   0x5   : > { %s247_s21 = ssub.s32 %s2975_s16, %s3061_s19  ;;  %p260_p0 = scmp.ne.s32.totalorder %s2971_s15, %s2967_s14 }
   0x6   : > { %p248_p1 = scmp.eq.s32.totalorder %s247_s21, 0  ;;  %p261_p2 = scmp.eq.s32.totalorder %s3057_s17, 1 }
   0x7   : > { %p266_p3 = scmp.ne.s32.totalorder %s2967_s14, %s2963_s13  ;;  %p267_p4 = scmp.eq.s32.totalorder %s2407_s18, 1 }
   0x8   : > { %s3072_s22 = scalar_select %p248_p1, %s2971_s15, %s250_s20  }
   0x9   : > { %p3074_p5 = por %p261_p2, %p260_p0  ;;  %p3078_p6 = por %p267_p4, %p266_p3 }
   0xa   : > { %p2410_p7 = scmp.ge.s32.totalorder %s2975_s16, 1  ;;  %p323_p8 = scmp.lt.s32.totalorder %s2975_s16, 3 }
   0xc   : > { %p324_p9 = pnand %p2410_p7, %p323_p8 }
   0xd   : > { %v459_v0 = vld [vmem:[%s3478_s4] sm:$0xff] (!%p324_p9)  ;;  %v460_v1 = vld [vmem:[%s3478_s4 + $0x8] sm:$0xff] (!%p324_p9)  ;;  %v2977_v3 = vmov (!%p324_p9), 0.0|0.0   ;;  %v461_v6 = vld [vmem:[%s3478_s4 + $0x10] sm:$0xff] (!%p324_p9)  ;;  %p364_p10 = scmp.lt.s32.totalorder (!%p324_p9), %s3057_s17, 1  ;;  %vm2978_vm0 = vmmov (!%p324_p9), 0  }
   0xe   : > { %327 = sbr.rel (%p324_p9) target bundleno = 3885 (0xf2d), region = 60  ;;  %v374_v2 = vld [vmem:[%s3476_s2] sm:$0xff] (!%p324_p9)  ;;  %2789 = vmatprep.subr.bf16.mxu1 (!%p324_p9), %v2977_v3  ;;  %v2790_v4 = vpack.c.bf16 (!%p324_p9), %v460_v1, %v459_v0  ;;  %2783 = vmatprep.subr.bf16.mxu0 (!%p324_p9), %v2977_v3  ;;  %v375_v5 = vld [vmem:[%s3476_s2 + $0x8] sm:$0xff] (!%p324_p9)  ;;  %v462_v7 = vld [vmem:[%s3478_s4 + $0x18] sm:$0xff] (!%p324_p9)  ;;  %v2979_v11 = vmov (!%p324_p9), 0.0   ;;  %vm385_vm1 = vcmask (!%p324_p9), 261120  }
   0xf   : > { %v2784_v8 = vpack.c.bf16 (!%p324_p9), %v375_v5, %v374_v2  ;;  %v376_v9 = vld [vmem:[%s3476_s2 + $0x10] sm:$0xff] (!%p324_p9)  ;;  %v377_v10 = vld [vmem:[%s3476_s2 + $0x18] sm:$0xff] (!%p324_p9)  ;;  %2610 = vmatprep.mubr.msk.f32.mxu1 (!%p324_p9), %vm2978_vm0, %v2979_v11  ;;  %2599 = vmatprep.mubr.msk.f32.mxu0 (!%p324_p9), %vm2978_vm0, %v2979_v11  ;;  %v2793_v12 = vpack.c.bf16 (!%p324_p9), %v462_v7, %v461_v6  ;;  %v2416_v16 = vld [vmem:[%s3479_s5] ss:$0 sm:$0xff] (!%p324_p9)  ;;  %vm624_vm2 = vcmask (!%p324_p9), 64512   ;;  %s361_s29 = sand.u32 (!%p324_p9), 1, %s2967_s14  }
  0x10   : > { %2791 = vmatpush3.bf16.msra.mxu1 (!%p324_p9), %v2790_v4  ;;  %v2787_v13 = vpack.c.bf16 (!%p324_p9), %v377_v10, %v376_v9  ;;  %v2414_v17 = vld [vmem:[%s3477_s3] ss:$0 sm:$0xff] (!%p324_p9)  ;;  %v544_v25 = vld [vmem:[%s3480_s6 + $0x8] sm:$0xff] (!%p324_p9)  ;;  %v545_v26 = vld [vmem:[%s3480_s6 + $0x10] sm:$0xff] (!%p324_p9)  ;;  %s2504_s18 = sshll.u32 (!%p324_p9), %s3057_s17, 7  ;;  %s2323_s28 = scalar_lea.sflag (!%p324_p9), [#allocation3], %s361_s29 }
  0x11   : > { %2785 = vmatpush3.bf16.msra.mxu0 (!%p324_p9), %v2784_v8  ;;  %2792 = vmatprep.subr.bf16.mxu1 (!%p324_p9), %v2977_v3  ;;  %v543_v24 = vld [vmem:[%s3480_s6] sm:$0xff] (!%p324_p9)  ;;  %v546_v28 = vld [vmem:[%s3480_s6 + $0x18] sm:$0xff] (!%p324_p9)  ;;  %v2424_v43 = vld [vmem:[%s3476_s2 + $0x28] sm:$0xff] (!%p324_p9)  ;;  %s3431_s27 = scalar_lea.hbm (!%p324_p9), %s3484_s10, %s2504_s18 }
  0x12   : > { %2786 = vmatprep.subr.bf16.mxu0 (!%p324_p9), %v2977_v3  ;;  %v2796_v27 = vpack.c.bf16 (!%p324_p9), %v544_v25, %v543_v24  ;;  %v2799_v29 = vpack.c.bf16 (!%p324_p9), %v546_v28, %v545_v26  ;;  %v2418_v39 = vld [vmem:[%s3481_s7] ss:$0 sm:$0xff] (!%p324_p9)  ;;  %v2425_v45 = vld [vmem:[%s3476_s2 + $0x30] sm:$0xff] (!%p324_p9)  ;;  %v2426_v46 = vld [vmem:[%s3476_s2 + $0x38] sm:$0xff] (!%p324_p9) }
  0x13   : > { %v2423_v42 = vld [vmem:[%s3476_s2 + $0x20] sm:$0xff] (!%p324_p9)  ;;  %v2805_v47 = vpack.c.bf16 (!%p324_p9), %v2426_v46, %v2425_v45  ;;  %v2431_v50 = vld [vmem:[%s3478_s4 + $0x28] sm:$0xff] (!%p324_p9)  ;;  %v2432_v54 = vld [vmem:[%s3478_s4 + $0x30] sm:$0xff] (!%p324_p9) }
  0x14   : > { %2794 = vmatpush3.bf16.msra.mxu1 (!%p324_p9), %v2793_v12  ;;  %v2802_v44 = vpack.c.bf16 (!%p324_p9), %v2424_v43, %v2423_v42  ;;  %v2430_v49 = vld [vmem:[%s3478_s4 + $0x20] sm:$0xff] (!%p324_p9)  ;;  %v2433_v55 = vld [vmem:[%s3478_s4 + $0x38] sm:$0xff] (!%p324_p9)  ;;  %v2438_v5 = vld [vmem:[%s3480_s6 + $0x28] sm:$0xff] (!%p324_p9) }
  0x15   : > { %s365_s30 = scalar_select %p364_p10, %s3057_s17, 1  ;;  %2788 = vmatpush3.bf16.msra.mxu0 %v2787_v13  ;;  %2624 = vmatprep.subr.mxu1 %v2979_v11  ;;  %v2808_v52 = vpack.c.bf16 %v2431_v50, %v2430_v49  ;;  %v2811_v56 = vpack.c.bf16 %v2433_v55, %v2432_v54  ;;  %v2435_v61 = vld [vmem:[%s3479_s5 + $0x1] ss:$0 sm:$0xff]  ;;  %v2439_v6 = vld [vmem:[%s3480_s6 + $0x30] sm:$0xff]  ;;  %v2440_v8 = vld [vmem:[%s3480_s6 + $0x38] sm:$0xff] }
  0x16   : > { %2795 = vmatprep.subr.bf16.mxu0 %v2977_v3  ;;  %v2428_v62 = vld [vmem:[%s3477_s3 + $0x1] ss:$0 sm:$0xff]  ;;  %v2817_v9 = vpack.c.bf16 %v2440_v8, %v2439_v6  ;;  %v2447_v25 = vld [vmem:[%s3482_s8 + $0x8] sm:$0xff]  ;;  %v2462_v46 = vld [vmem:[%s3479_s5 + $0x2] ss:$0 sm:$0xff]  ;;  %s2980_s17 = smov [#allocation2]  }
  0x17   : > { %s2412_s11 = sshll.u32 %s365_s30, 3  ;;  %v2437_v4 = vld [vmem:[%s3480_s6 + $0x20] sm:$0xff]  ;;  %s2411_s30 = sshll.u32 %s361_s29, 3 }
  0x18   : > { %s367_s20 = scalar_lea.vmem %s3474_s0, %s2412_s11  ;;  %s371_s26 = scalar_lea.vmem %s3475_s1, %s2412_s11  ;;  %v2814_v7 = vpack.c.bf16 %v2438_v5, %v2437_v4 }
  0x19   : > { %v3124_v14 = vld [vmem:[%s367_s20] sm:$0xff]  ;;  %s363_s20 = scalar_lea.vmem [#allocation2], %s2411_s30  ;;  %s2917_s30 = sshll.u32 %s2980_s17, 4  ;;  %s2918_s30 = int_to_ptr.vmem [resolvable:$false] %s2917_s30 }
  0x1a   : > { %v3126_v15 = vld [vmem:[%s371_s26] sm:$0xff]  ;;  %2611 = vmatmul.mubr.msk.f32.vlgmr.msra.gmra.mrb[0].mxu1 %vm385_vm1, %v3124_v14  ;;  %s2336_s21 = sshll.u32 %s363_s20, 4  ;;  %s2919_s12 = scalar_lea.vmem %s2918_s30, 256  ;;  %s3433_s21 = int_to_ptr.vmem [resolvable:$true] %s2336_s21 }
  0x1b   : > { %2600 = vmatmul.mubr.msk.f32.vlgmr.msra.gmra.mrb[0].mxu0 %vm385_vm1, %v3126_v15  ;;  %2626 = vmatprep.mubr.msk.f32.mxu1 %vm2978_vm0, %v2979_v11  ;;  %s2913_s11 = scalar_lea.vmem %s3433_s21, 128  ;;  %p2920_p0 = scmp.lt.s32.totalorder %s3433_s21, %s2918_s30 }
  0x1c   : > { %2621 = vmatprep.mubr.msk.f32.mxu0 %vm2978_vm0, %v2979_v11  ;;  %2797 = vmatpush3.bf16.msra.mxu0 %v2796_v27  ;;  %p2914_p11 = scmp.ne.s32.totalorder %s3433_s21, %s2913_s11  ;;  %p2921_p1 = scmp.lt.s32.totalorder %s2919_s12, %s2913_s11 }
  0x1d   : > { %2798 = vmatprep.subr.bf16.mxu0 %v2977_v3 }
  0x1e   : > { %p2915_p12 = pnand %p2914_p11, %p3074_p5  ;;  %p2922_p2 = por %p2921_p1, %p2920_p0 }
  0x20   : > { %2800 = vmatpush3.bf16.msra.mxu0 %v2799_v29  ;;  %v785_v29 = vld [vmem:[%s3482_s8] sm:$0xff]  ;;  %p2916_p13 = pneg %p2915_p12 }
  0x21   : > { %2801 = vmatprep.subr.bf16.mxu0 %v2977_v3 }
  0x22   : > { %p2923_p3 = pnand %p2922_p2, %p2916_p13 }
  0x23   : > { %2622 = vmatmul.mubr.msk.f32.vlgmr.msra.gmra.mrb[2].mxu0 %vm385_vm1, %v3124_v14 }
  0x24   : > { %2642 = vmatprep.mubr.msk.f32.mxu0 %vm2978_vm0, %v2979_v11  ;;  %2803 = vmatpush3.bf16.msra.mxu0 %v2802_v44 }
  0x25   : > { %2804 = vmatprep.subr.bf16.mxu0 %v2977_v3 }
  0x28   : > { %2806 = vmatpush3.bf16.msra.mxu0 %v2805_v47 }
  0x29   : > { %2813 = vmatprep.subr.bf16.mxu0 %v2977_v3 }
  0x2b   : > { %2643 = vmatmul.mubr.msk.f32.vlgmr.msra.gmra.mrb[4].mxu0 %vm385_vm1, %v3126_v15 }
  0x2c   : > { %2664 = vmatprep.mubr.msk.f32.mxu0 %vm2978_vm0, %v2979_v11  ;;  %2815 = vmatpush3.bf16.msra.mxu0 %v2814_v7 }
  0x2d   : > { %2816 = vmatprep.subr.bf16.mxu0 %v2977_v3 }
  0x30   : > { %2818 = vmatpush3.bf16.msra.mxu0 %v2817_v9  ;;  %v2469_v9 = vld [vmem:[%s3481_s7 + $0x2] ss:$0 sm:$0xff] }
  0x31   : > { %2677 = vmatprep.subr.mxu0 %v2979_v11 }
  0x33   : > { %2665 = vmatmul.mubr.msk.f32.vlgmr.msra.gmra.mrb[6].mxu0 %vm385_vm1, %v3124_v14 }
  0x34   : > { %2679 = vmatprep.mubr.msk.f32.mxu0 %vm2978_vm0, %v2979_v11  ;;  %2678 = vmatpush3.msra.mxu0 %v2447_v25  ;;  %v2483_v25 = vld [vmem:[%s3478_s4 + $0x60] sm:$0xff] }
  0x35   : > { %2819 = vmatprep.subr.bf16.mxu0 %v2977_v3 }
  0xed   : > { %v539_v18 = vpop.f32.mrb[0].mxu1 }
  0xee   : > { %v540_v19 = vadd.f32 %v2416_v16, %v539_v18  ;;  %v2612_v20 = vpop.f32.mrb[1].mxu1  ;;  %v455_v21 = vpop.f32.mrb[0].mxu0 }
  0xef   : > { %v456_v22 = vadd.f32 %v2414_v17, %v455_v21  ;;  %v2601_v23 = vpop.f32.mrb[1].mxu0 }
  0xf0   : > { %2625 = vmatpush3.xpose.msk.msra.mxu1 %vm624_vm2, %v540_v19 }
  0xf1   : > { %2629 = vmatprep.subr.mxu1 %v2979_v11 }
  0xf3   : > { %2627 = vmatmul.mubr.msk.f32.vlgmr.msra.gmra.mrb[2].mxu1 %vm624_vm2, %v456_v22  ;;  %v2442_v22 = vld [vmem:[%s3481_s7 + $0x1] ss:$0 sm:$0xff] }
  0xf4   : > { %2631 = vmatprep.mubr.msk.f32.mxu1 %vm2978_vm0, %v2979_v11 }
  0xf6   : > { %v620_v38 = vpop.f32.mrb[2].mxu0 }
  0xf7   : > { %v2623_v40 = vpop.f32.mrb[3].mxu0  ;;  %v621_v41 = vadd.f32 %v2418_v39, %v620_v38  ;;  %v2452_v39 = vld [vmem:[%s3476_s2 + $0x50] sm:$0xff] }
  0xf8   : > { %v2453_v40 = vld [vmem:[%s3476_s2 + $0x58] sm:$0xff] }
  0xf9   : > { %2630 = vmatpush3.msra.mxu1 %v621_v41  ;;  %v2823_v43 = vpack.c.bf16 %v2453_v40, %v2452_v39 }
  0xfa   : > { %2807 = vmatprep.subr.bf16.mxu1 %v2977_v3 }
  0xfe   : > { %v865_v57 = vpop.f32.mrb[4].mxu0 }
  0xff   : > { %v2644_v58 = vpop.f32.mrb[5].mxu0  ;;  %v866_v2 = vadd.f32 %v2428_v62, %v865_v57  ;;  %v2464_v57 = vld [vmem:[%s3480_s6 + $0x40] sm:$0xff] }
 0x100   : > { %v2465_v58 = vld [vmem:[%s3480_s6 + $0x48] sm:$0xff] }
 0x106   : > { %v1031_v21 = vpop.f32.mrb[6].mxu0 }
 0x107   : > { %v2666_v23 = vpop.f32.mrb[7].mxu0  ;;  %v1032_v24 = vadd.f32 %v2442_v22, %v1031_v21  ;;  %v2478_v22 = vld [vmem:[%s3476_s2 + $0x70] sm:$0xff] }
 0x108   : > { %v2479_v23 = vld [vmem:[%s3476_s2 + $0x78] sm:$0xff] }
 0x1c6   : > { %v697_v30 = vpop.f32.mrb[2].mxu1 }
 0x1c7   : > { %v2628_v31 = vpop.f32.mrb[3].mxu1  ;;  %v701_v32 = vsel %vm624_vm2, %v697_v30, -inf }
 0x1c8   : > { %702 = vmax.xlane.f32.xlu0 %v701_v32  ;;  %v2458_v31 = vld [vmem:[%s3478_s4 + $0x48] sm:$0xff] }
 0x255   : > { %v703_v33 = vpop.xlane.xlu0 %702 }
 0x256   : > { %v704_v34 = vsub.f32 %v697_v30, %v703_v33  ;;  %v2457_v30 = vld [vmem:[%s3478_s4 + $0x40] sm:$0xff]  ;;  %v2459_v33 = vld [vmem:[%s3478_s4 + $0x50] sm:$0xff] }
 0x257   : > { %v2826_v32 = vpack.c.bf16 %v2458_v31, %v2457_v30 }
 0x258   : > { %v705_v35 = vmul.f32 1.442695, %v704_v34  ;;  %v2460_v34 = vld [vmem:[%s3478_s4 + $0x58] sm:$0xff] }
 0x25a   : > { %2897 = vpow2.f32 %v705_v35  ;;  %v2829_v35 = vpack.c.bf16 %v2460_v34, %v2459_v33 }
 0x264   : > { %v2898_v36 = vpop.eup %2897 }
 0x265   : > { %v707_v37 = vsel %vm624_vm2, %v2898_v36, 0.0 }
 0x266   : > { %708 = vadd.xlane.f32.xlu0 %v707_v37  ;;  %v2451_v37 = vld [vmem:[%s3476_s2 + $0x48] sm:$0xff] }
 0x2f3   : > { %v709_v48 = vpop.xlane.xlu0 %708 }
 0x2f4   : > { %2899 = vrcp.f32 %v709_v48 }
 0x2fe   : > { %v2900_v51 = vpop.eup %2899 }
 0x2ff   : > { %v711_v53 = vmul.f32 %v2900_v51, %v2898_v36  ;;  %v2450_v36 = vld [vmem:[%s3476_s2 + $0x40] sm:$0xff] }
 0x300   : > { %v2820_v38 = vpack.c.bf16 %v2451_v37, %v2450_v36  ;;  %v2488_v37 = vld [vmem:[%s3479_s5 + $0x3] ss:$0 sm:$0xff] }
 0x301   : > { %2632 = vmatmul.mubr.msk.f32.vlgmr.msra.gmra.mrb[4].mxu1 %vm624_vm2, %v711_v53  ;;  %v2455_v53 = vld [vmem:[%s3477_s3 + $0x2] ss:$0 sm:$0xff] }
 0x302   : > { %2809 = vmatpush3.bf16.msra.mxu1 %v2808_v52  ;;  %2653 = vmatprep.mubr.msk.f32.mxu1 %vm2978_vm0, %v2979_v11 }
 0x303   : > { %2810 = vmatprep.subr.bf16.mxu1 %v2977_v3 }
 0x306   : > { %2812 = vmatpush3.bf16.msra.mxu1 %v2811_v56 }
 0x307   : > { %2667 = vmatprep.subr.mxu1 %v2979_v11 }
 0x309   : > { %2654 = vmatmul.mubr.msk.f32.vlgmr.msra.gmra.mrb[6].mxu1 %vm385_vm1, %v3124_v14 }
 0x30a   : > { %2669 = vmatprep.mubr.msk.f32.mxu1 %vm2978_vm0, %v2979_v11 }
 0x3d4   : > { %v781_v59 = vpop.f32.mrb[4].mxu1 }
 0x3d5   : > { %v2633_v60 = vpop.f32.mrb[5].mxu1 }
 0x3d6   : > { %v2832_v60 = vpack.c.bf16 %v2465_v58, %v2464_v57  ;;  %v2500_v58 = vld [vmem:[%s3482_s8 + $0x18] sm:$0xff] }
 0x3dc   : > { %v948_v63 = vpop.f32.mrb[6].mxu1 }
 0x3dd   : > { %v949_v0 = vadd.f32 %v2435_v61, %v948_v63  ;;  %v2655_v1 = vpop.f32.mrb[7].mxu1  ;;  %v2467_v61 = vld [vmem:[%s3480_s6 + $0x58] sm:$0xff] }
 0x3df   : > { %2668 = vmatpush3.xpose.msk.msra.mxu1 %vm624_vm2, %v949_v0 }
 0x3e0   : > { %2672 = vmatprep.subr.mxu1 %v2979_v11 }
 0x3e2   : > { %2670 = vmatmul.mubr.msk.f32.vlgmr.msra.gmra.mrb[8].mxu1 %vm624_vm2, %v866_v2 }
 0x3e3   : > { %2674 = vmatprep.mubr.msk.f32.mxu1 %vm2978_vm0, %v2979_v11  ;;  %2673 = vmatpush3.msra.mxu1 %v1032_v24  ;;  %v2841_v24 = vpack.c.bf16 %v2479_v23, %v2478_v22 }
 0x3e4   : > { %2682 = vmatprep.subr.mxu1 %v2979_v11 }
 0x4b5   : > { %v1107_v10 = vpop.f32.mrb[8].mxu1 }
 0x4b6   : > { %v2671_v12 = vpop.f32.mrb[9].mxu1  ;;  %v1111_v13 = vsel %vm624_vm2, %v1107_v10, -inf }
 0x4b7   : > { %1112 = vmax.xlane.f32.xlu1 %v1111_v13  ;;  %v2474_v13 = vld [vmem:[%s3482_s8 + $0x10] sm:$0xff] }
 0x544   : > { %v1113_v16 = vpop.xlane.xlu1 %1112 }
 0x545   : > { %v1114_v17 = vsub.f32 %v1107_v10, %v1113_v16 }
 0x547   : > { %v1115_v18 = vmul.f32 1.442695, %v1114_v17 }
 0x549   : > { %2901 = vpow2.f32 %v1115_v18 }
 0x553   : > { %v2902_v19 = vpop.eup %2901 }
 0x554   : > { %v1117_v20 = vsel %vm624_vm2, %v2902_v19, 0.0 }
 0x555   : > { %1118 = vadd.xlane.f32.xlu1 %v1117_v20  ;;  %v2477_v20 = vld [vmem:[%s3476_s2 + $0x68] sm:$0xff] }
 0x5e2   : > { %v1119_v26 = vpop.xlane.xlu1 %1118 }
 0x5e3   : > { %2903 = vrcp.f32 %v1119_v26  ;;  %v2484_v26 = vld [vmem:[%s3478_s4 + $0x68] sm:$0xff] }
 0x5ed   : > { %v2904_v27 = vpop.eup %2903 }
 0x5ee   : > { %v1121_v28 = vmul.f32 %v2904_v27, %v2902_v19  ;;  %v2476_v19 = vld [vmem:[%s3476_s2 + $0x60] sm:$0xff]  ;;  %v2844_v27 = vpack.c.bf16 %v2484_v26, %v2483_v25 }
 0x5ef   : > { %v2838_v21 = vpack.c.bf16 %v2477_v20, %v2476_v19 }
 0x5f0   : > { %2675 = vmatmul.mubr.msk.f32.vlgmr.msra.gmra.mrb[10].mxu1 %vm624_vm2, %v1121_v28  ;;  %v2485_v28 = vld [vmem:[%s3478_s4 + $0x70] sm:$0xff] }
 0x5f1   : > { %2683 = vmatpush3.msra.mxu1 %v785_v29  ;;  %2684 = vmatprep.mubr.msk.f32.mxu1 %vm2978_vm0, %v2979_v11 }
 0x5f2   : > { %2825 = vmatprep.subr.bf16.mxu1 %v2977_v3 }
 0x5f4   : > { %2685 = vmatmul.mubr.msk.f32.vlgmr.msra.gmra.mrb[12].mxu1 %vm624_vm2, %v781_v59  ;;  %v2466_v59 = vld [vmem:[%s3480_s6 + $0x50] sm:$0xff] }
 0x5f5   : > { %2827 = vmatpush3.bf16.msra.mxu1 %v2826_v32  ;;  %2706 = vmatprep.mubr.msk.f32.mxu1 %vm2978_vm0, %v2979_v11  ;;  %v2835_v62 = vpack.c.bf16 %v2467_v61, %v2466_v59 }
 0x5f6   : > { %2828 = vmatprep.subr.bf16.mxu1 %v2977_v3 }
 0x5f9   : > { %2830 = vmatpush3.bf16.msra.mxu1 %v2829_v35 }
 0x5fa   : > { %2720 = vmatprep.subr.mxu1 %v2979_v11 }
 0x5fc   : > { %2707 = vmatmul.mubr.msk.f32.vlgmr.msra.gmra.mrb[14].mxu1 %vm385_vm1, %v3124_v14 }
 0x5fd   : > { %2722 = vmatprep.mubr.msk.f32.mxu1 %vm2978_vm0, %v2979_v11 }
 0x6c3   : > { %v1191_v41 = vpop.f32.mrb[10].mxu1 }
 0x6c4   : > { %v2676_v42 = vpop.f32.mrb[11].mxu1  ;;  %2680 = vmatmul.mubr.msk.f32.vlgmr.msra.gmra.mrb[8].mxu0 %vm624_vm2, %v1191_v41 }
 0x6c5   : > { %2821 = vmatpush3.bf16.msra.mxu0 %v2820_v38  ;;  %2695 = vmatprep.mubr.msk.f32.mxu0 %vm2978_vm0, %v2979_v11  ;;  %v2481_v38 = vld [vmem:[%s3477_s3 + $0x3] ss:$0 sm:$0xff] }
 0x6c6   : > { %2822 = vmatprep.subr.bf16.mxu0 %v2977_v3 }
 0x6c7   : > { %v1339_v44 = vpop.f32.mrb[12].mxu1 }
 0x6c8   : > { %v2686_v45 = vpop.f32.mrb[13].mxu1 }
 0x6c9   : > { %2824 = vmatpush3.bf16.msra.mxu0 %v2823_v43  ;;  %v2490_v43 = vld [vmem:[%s3480_s6 + $0x60] sm:$0xff]  ;;  %v2492_v45 = vld [vmem:[%s3480_s6 + $0x70] sm:$0xff] }
 0x6ca   : > { %2831 = vmatprep.subr.bf16.mxu0 %v2977_v3 }
 0x6cc   : > { %2696 = vmatmul.mubr.msk.f32.vlgmr.msra.gmra.mrb[10].mxu0 %vm385_vm1, %v3126_v15 }
 0x6cd   : > { %2717 = vmatprep.mubr.msk.f32.mxu0 %vm2978_vm0, %v2979_v11  ;;  %2833 = vmatpush3.bf16.msra.mxu0 %v2832_v60 }
 0x6ce   : > { %2834 = vmatprep.subr.bf16.mxu0 %v2977_v3 }
 0x6cf   : > { %v1505_v47 = vpop.f32.mrb[14].mxu1 }
 0x6d0   : > { %v1506_v48 = vadd.f32 %v2462_v46, %v1505_v47  ;;  %v2708_v49 = vpop.f32.mrb[15].mxu1  ;;  %v2493_v47 = vld [vmem:[%s3480_s6 + $0x78] sm:$0xff] }
 0x6d1   : > { %2836 = vmatpush3.bf16.msra.mxu0 %v2835_v62 }
 0x6d2   : > { %2721 = vmatpush3.xpose.msk.msra.mxu1 %vm624_vm2, %v1506_v48  ;;  %2730 = vmatprep.subr.mxu0 %v2979_v11  ;;  %v2853_v48 = vpack.c.bf16 %v2493_v47, %v2492_v45 }
 0x6d3   : > { %2725 = vmatprep.subr.mxu1 %v2979_v11 }
 0x6d4   : > { %2718 = vmatmul.mubr.msk.f32.vlgmr.msra.gmra.mrb[12].mxu0 %vm385_vm1, %v3124_v14 }
 0x6d5   : > { %2732 = vmatprep.mubr.msk.f32.mxu0 %vm2978_vm0, %v2979_v11  ;;  %2731 = vmatpush3.msra.mxu0 %v2474_v13 }
 0x6d6   : > { %2843 = vmatprep.subr.bf16.mxu0 %v2977_v3 }
 0x797   : > { %v1266_v50 = vpop.f32.mrb[8].mxu0 }
 0x798   : > { %v3305_v51 = vadd.f32 %v1339_v44, %v1266_v50  ;;  %v2681_v52 = vpop.f32.mrb[9].mxu0  ;;  %v2491_v44 = vld [vmem:[%s3480_s6 + $0x68] sm:$0xff] }
 0x799   : > { %v2850_v46 = vpack.c.bf16 %v2491_v44, %v2490_v43 }
 0x79f   : > { %v1422_v54 = vpop.f32.mrb[10].mxu0 }
 0x7a0   : > { %v1423_v55 = vadd.f32 %v2455_v53, %v1422_v54  ;;  %v2697_v56 = vpop.f32.mrb[11].mxu0 }
 0x7a2   : > { %2723 = vmatmul.mubr.msk.f32.vlgmr.msra.gmra.mrb[16].mxu1 %vm624_vm2, %v1423_v55 }
 0x7a3   : > { %2727 = vmatprep.mubr.msk.f32.mxu1 %vm2978_vm0, %v2979_v11 }
 0x7a7   : > { %v1588_v8 = vpop.f32.mrb[12].mxu0 }
 0x7a8   : > { %v2719_v10 = vpop.f32.mrb[13].mxu0  ;;  %v1589_v12 = vadd.f32 %v2469_v9, %v1588_v8 }
 0x7aa   : > { %2726 = vmatpush3.msra.mxu1 %v1589_v12 }
 0x7ab   : > { %2837 = vmatprep.subr.bf16.mxu1 %v2977_v3 }
 0x875   : > { %v1664_v63 = vpop.f32.mrb[16].mxu1 }
 0x876   : > { %v2724_v0 = vpop.f32.mrb[17].mxu1  ;;  %v1668_v1 = vsel %vm624_vm2, %v1664_v63, -inf }
 0x877   : > { %1669 = vmax.xlane.f32.xlu0 %v1668_v1  ;;  %v2502_v1 = vld [vmem:[%s3483_s9] ss:$0 sm:$0xff] }
 0x904   : > { %v1670_v2 = vpop.xlane.xlu0 %1669 }
 0x905   : > { %v1671_v4 = vsub.f32 %v1664_v63, %v1670_v2 }
 0x907   : > { %v1672_v5 = vmul.f32 1.442695, %v1671_v4 }
 0x909   : > { %2905 = vpow2.f32 %v1672_v5 }
 0x913   : > { %v2906_v6 = vpop.eup %2905 }
 0x914   : > { %v1674_v7 = vsel %vm624_vm2, %v2906_v6, 0.0 }
 0x915   : > { %1675 = vadd.xlane.f32.xlu1 %v1674_v7 }
 0x9a2   : > { %v1676_v16 = vpop.xlane.xlu1 %1675 }
 0x9a3   : > { %2907 = vrcp.f32 %v1676_v16 }
 0x9ad   : > { %v2908_v17 = vpop.eup %2907 }
 0x9ae   : > { %v1678_v18 = vmul.f32 %v2908_v17, %v2906_v6 }
 0x9b0   : > { %2728 = vmatmul.mubr.msk.f32.vlgmr.msra.gmra.mrb[18].mxu1 %vm624_vm2, %v1678_v18 }
 0x9b1   : > { %2743 = vmatprep.mubr.msk.f32.mxu1 %vm2978_vm0, %v2979_v11  ;;  %2839 = vmatpush3.bf16.msra.mxu1 %v2838_v21 }
 0x9b2   : > { %2840 = vmatprep.subr.bf16.mxu1 %v2977_v3 }
 0x9b5   : > { %2842 = vmatpush3.bf16.msra.mxu1 %v2841_v24 }
 0x9b6   : > { %2849 = vmatprep.subr.bf16.mxu1 %v2977_v3 }
 0x9b8   : > { %2744 = vmatmul.mubr.msk.f32.vlgmr.msra.gmra.mrb[20].mxu1 %vm385_vm1, %v3126_v15  ;;  %v2486_v15 = vld [vmem:[%s3478_s4 + $0x78] sm:$0xff] }
 0x9b9   : > { %2765 = vmatprep.mubr.msk.f32.mxu1 %vm2978_vm0, %v2979_v11  ;;  %v2847_v31 = vpack.c.bf16 %v2486_v15, %v2485_v28  ;;  %2851 = vmatpush3.bf16.msra.mxu1 %v2850_v46 }
 0x9ba   : > { %2852 = vmatprep.subr.bf16.mxu1 %v2977_v3 }
 0x9bd   : > { %2854 = vmatpush3.bf16.msra.mxu1 %v2853_v48 }
 0x9be   : > { %2778 = vmatprep.subr.mxu1 %v2979_v11 }
 0x9c0   : > { %2766 = vmatmul.mubr.msk.f32.vlgmr.msra.gmra.mrb[22].mxu1 %vm385_vm1, %v3124_v14 }
 0x9c1   : > { %2780 = vmatprep.mubr.msk.f32.mxu1 %vm2978_vm0, %v2979_v11  ;;  %2779 = vmatpush3.msra.mxu1 %v2500_v58 }
 0xa83   : > { %v1748_v29 = vpop.f32.mrb[18].mxu1 }
 0xa84   : > { %v2729_v30 = vpop.f32.mrb[19].mxu1  ;;  %2733 = vmatmul.mubr.msk.f32.vlgmr.msra.gmra.mrb[14].mxu0 %vm624_vm2, %v1748_v29 }
 0xa85   : > { %2845 = vmatpush3.bf16.msra.mxu0 %v2844_v27  ;;  %2754 = vmatprep.mubr.msk.f32.mxu0 %vm2978_vm0, %v2979_v11 }
 0xa86   : > { %2846 = vmatprep.subr.bf16.mxu0 %v2977_v3 }
 0xa89   : > { %2848 = vmatpush3.bf16.msra.mxu0 %v2847_v31 }
 0xa8a   : > { %2768 = vmatprep.subr.mxu0 %v2979_v11 }
 0xa8b   : > { %v1907_v32 = vpop.f32.mrb[20].mxu1 }
 0xa8c   : > { %2755 = vmatmul.mubr.msk.f32.vlgmr.msra.gmra.mrb[16].mxu0 %vm385_vm1, %v3124_v14  ;;  %v2745_v33 = vpop.f32.mrb[21].mxu1  ;;  %v1908_v42 = vadd.f32 %v2481_v38, %v1907_v32  ;;  %v2495_v14 = vld [vmem:[%s3481_s7 + $0x3] ss:$0 sm:$0xff] }
 0xa8d   : > { %2770 = vmatprep.mubr.msk.f32.mxu0 %vm2978_vm0, %v2979_v11 }
 0xa93   : > { %v2073_v56 = vpop.f32.mrb[22].mxu1 }
 0xa94   : > { %v2074_v57 = vadd.f32 %v2495_v14, %v2073_v56 }
 0xb57   : > { %v1823_v34 = vpop.f32.mrb[14].mxu0 }
 0xb58   : > { %v1827_v35 = vadd.f32 %v1823_v34, %v3305_v51  ;;  %v2734_v36 = vpop.f32.mrb[15].mxu0 }
 0xb5f   : > { %v1990_v39 = vpop.f32.mrb[16].mxu0 }
 0xb60   : > { %v1991_v40 = vadd.f32 %v2488_v37, %v1990_v39  ;;  %v2756_v41 = vpop.f32.mrb[17].mxu0 }
 0xb62   : > { %2769 = vmatpush3.xpose.msk.msra.mxu0 %vm624_vm2, %v1991_v40 }
 0xb63   : > { %2773 = vmatprep.subr.mxu0 %v2979_v11 }
 0xb65   : > { %2771 = vmatmul.mubr.msk.f32.vlgmr.msra.gmra.mrb[18].mxu0 %vm624_vm2, %v1908_v42 }
 0xb66   : > { %2775 = vmatprep.mubr.msk.f32.mxu0 %vm2978_vm0, %v2979_v11  ;;  %v2767_v11 = vpop.f32.mrb[23].mxu1  ;;  %2774 = vmatpush3.msra.mxu0 %v2074_v57 }
 0xc38   : > { %v2149_v49 = vpop.f32.mrb[18].mxu0 }
 0xc39   : > { %v2772_v50 = vpop.f32.mrb[19].mxu0  ;;  %v2153_v51 = vsel %vm624_vm2, %v2149_v49, -inf }
 0xc3a   : > { %2154 = vmax.xlane.f32.xlu0 %v2153_v51 }
 0xcc7   : > { %v2155_v52 = vpop.xlane.xlu0 %2154 }
 0xcc8   : > { %v2156_v53 = vsub.f32 %v2149_v49, %v2155_v52 }
 0xcca   : > { %v2157_v54 = vmul.f32 1.442695, %v2156_v53 }
 0xccc   : > { %2909 = vpow2.f32 %v2157_v54 }
 0xcd6   : > { %v2910_v55 = vpop.eup %2909 }
 0xcd7   : > { %v2159_v3 = vsel %vm624_vm2, %v2910_v55, 0.0 }
 0xcd8   : > { %2160 = vadd.xlane.f32.xlu1 %v2159_v3 }
 0xd65   : > { %v2161_v59 = vpop.xlane.xlu1 %2160 }
 0xd66   : > { %2911 = vrcp.f32 %v2161_v59 }
 0xd70   : > { %v2912_v60 = vpop.eup %2911 }
 0xd71   : > { %v2163_v61 = vmul.f32 %v2912_v60, %v2910_v55 }
 0xd73   : > { %2776 = vmatmul.mubr.msk.f32.vlgmr.msra.gmra.mrb[20].mxu0 %vm624_vm2, %v2163_v61 }
 0xe46   : > { %v2233_v62 = vpop.f32.mrb[20].mxu0 }
 0xe47   : > { %v2777_v63 = vpop.f32.mrb[21].mxu0  ;;  %2781 = vmatmul.mubr.msk.f32.vlgmr.msra.gmra.mrb[24].mxu1 %vm624_vm2, %v2233_v62 }
 0xf1a   : > { %v2308_v0 = vpop.f32.mrb[24].mxu1 }
 0xf1b   : > { %v2312_v2 = vadd.f32 %v2308_v0, %v1827_v35  ;;  %v2782_v4 = vpop.f32.mrb[25].mxu1 }
 0xf1d   : > { %v2320_v5 = vadd.f32 %v2502_v1, %v2312_v2 }
 0xf1f   : > { %2321 = vst.msk [vmem:[%s363_s20] sm:$0xff] %vm385_vm1, %v2320_v5 }
 0xf20   : > { %2926 = shalt.err (!%p2923_p3)
}
 0xf21   : > { %s2927_s29 = scalar_lea.hbm %s3431_s27, 128  ;;  %s2931_s25 = scalar_lea.hbm %s3484_s10, 256 }
 0xf22   : > { %p2928_p4 = scmp.ne.s32.totalorder %s3431_s27, %s2927_s29  ;;  %p2932_p9 = scmp.lt.u32.totalorder %s3431_s27, %s3484_s10 }
 0xf23   : > { %p2933_p10 = scmp.lt.u32.totalorder %s2931_s25, %s2927_s29  ;;  %p2935_p12 = scmp.lt.u32.totalorder %s2927_s29, %s3431_s27 }
 0xf24   : > { %p2929_p7 = pnand %p2928_p4, %p3074_p5 }
 0xf25   : > { %p2934_p11 = por %p2933_p10, %p2932_p9 }
 0xf26   : > { %p2930_p8 = pneg %p2929_p7 }
 0xf27   : > { %p2936_p13 = por %p2935_p12, %p2934_p11 }
 0xf29   : > { %p2937_p0 = pnand %p2936_p13, %p2930_p8 }
 0xf2b   : > { %2940 = shalt.err (!%p2937_p0)
}
 0xf2c   : > { %2855 = dma.vmem_to_hbm [thread:$0]  (%p3074_p5), %s3433_s21, 128, %s3431_s27, %s2323_s28  }
 0xf2d PF: > { %p2861_p1 = scmp.ge.s32.totalorder %s2975_s16, 2  ;;  %s2348_s11 = sand.u32 1, %s2963_s13  }
 0xf2e   : > { %s2349_s30 = scalar_lea.sflag [#allocation3], %s2348_s11 }
 0xf2f   : > { %p2858_p2 = pnand %p2861_p1, %p3078_p6 }
 0xf31   : > { %2958 = dma.done.wait (!%p2858_p2), %s2349_s30, 128  }
 0xf32   : > { %2960 = vsyncadd (!%p2858_p2), %s2349_s30, 4294967168  ;;  %p20_p3 = scmp.ge.s32.totalorder %s3061_s19, 4   ;;  %s3487_s13 = smov %s2967_s14 }
 0xf33   : > { %s3488_s14 = smov %s2971_s15  ;;  %s3489_s15 = smov %s3072_s22 }
 0xf34   : > { %s3490_s16 = smov %s3061_s19  ;;  %22 = sbr.rel (!%p20_p3) target bundleno = 3 (0x3), region = 119 }
 0xf3b   :  { %2354 = vsyncpa [#allocation3], 1 }
 0xf3c   :  { %2356 = vsyncpa [#allocation3 + $0x1], 1 }

</bundles_post_ra>
